<compile_context>
chip_gen: v7x
topology: tpu7x:2x2x1
jax: 0.10.0
libtpu: 0.0.40
codegen_flags: <defaults>
</compile_context>

<pallas_src>
import jax
import jax.numpy as jnp
from jax import lax
from jax.experimental import pallas as pl
from jax.experimental.pallas import tpu as pltpu


# ----------------------------- Pallas kernel -------------------------------
def decoder_kernel(x_ref, h0_ref, hs_ref, w_ref, wo_ref, y_ref,
                   gx_sc, attn_sc, hnew_sc):
    f32 = jnp.float32
    TB, O = x_ref.shape
    B, H = h0_ref.shape
    T = gx_sc.shape[0]

    # ---- Loop-invariant loads (two packed weight slabs). ----
    w = w_ref[...]                          # (O + H + 2, 4H)
    wx = w[0:O]                             # (O, 4H)  [wa_x | W_ir | W_iz | W_in]
    wh = w[O:O + H]                         # (H, 4H)  [wa_h | W_hr | W_hz | W_hn]
    bx = w[O + H:O + H + 1]                 # (1, 4H)  [attn_b | b_ir | b_iz | b_in]
    bh = w[O + H + 1:O + H + 2]             # (1, 4H)  [0      | b_hr | b_hz | b_hn]

    wob = wo_ref[...]                       # (2H + 1, O)
    wo = wob[0:2 * H]                       # (2H, O)  cat order: (context, hidden)
    bo = wob[2 * H:2 * H + 1]               # (1, O)

    # ---- Hoisted input-side fused matmul over ALL timesteps at once. ----
    gx_all = jnp.dot(x_ref[...], wx, preferred_element_type=f32) + bx    # (T*B, 4H)
    gx_sc[...] = gx_all.reshape(T, B, 4 * H)

    # ---- Serial recurrence: only what feeds h(t). ----
    def step(t, hidden):                    # hidden: (B, H), carried in registers
        gx = gx_sc[t]                                                    # (B, 4H)
        gh = jnp.dot(hidden, wh, preferred_element_type=f32) + bh        # (B, 4H)

        # attn_t = Linear(cat(hidden, inputs)) — deferred, only stash it.
        attn_sc[t] = gx[:, 0:H] + gh[:, 0:H]

        # GRUCell (PyTorch gate order r, z, n).
        r = jax.nn.sigmoid(gx[:, H:2 * H] + gh[:, H:2 * H])
        z = jax.nn.sigmoid(gx[:, 2 * H:3 * H] + gh[:, 2 * H:3 * H])
        n = jnp.tanh(gx[:, 3 * H:4 * H] + r * gh[:, 3 * H:4 * H])
        h_new = (1.0 - z) * n + z * hidden                               # (B, H)
        hnew_sc[t] = h_new
        return h_new

    lax.fori_loop(0, T, step, h0_ref[...], unroll=True)

    # ---- Deferred attention + output projection, batched over all T. ----
    hs = hs_ref[...]                        # (B, S, H)
    attn = attn_sc[...]                     # (T, B, H)
    hstk = hnew_sc[...]                     # (T, B, H)

    # scores[t,b,s] = sum_h hs[b,s,h] * attn[t,b,h]   (MXU batched contraction)
    scores = jnp.einsum('tbh,bsh->tbs', attn, hs, preferred_element_type=f32)
    m = jnp.max(scores, axis=-1, keepdims=True)
    e = jnp.exp(scores - m)
    probs = e / jnp.sum(e, axis=-1, keepdims=True)                       # exact softmax
    # context[t,b,h] = sum_s probs[t,b,s] * hs[b,s,h]
    context = jnp.einsum('tbs,bsh->tbh', probs, hs, preferred_element_type=f32)

    # output = log_softmax(Linear(cat(context, h_new))) over all T*B rows at once.
    co = jnp.concatenate([context, hstk], axis=-1).reshape(TB, 2 * H)    # (T*B, 2H)
    logits = jnp.dot(co, wo, preferred_element_type=f32) + bo            # (T*B, O)
    lm = jnp.max(logits, axis=-1, keepdims=True)
    lse = jnp.log(jnp.sum(jnp.exp(logits - lm), axis=-1, keepdims=True)) + lm
    y_ref[...] = logits - lse               # single slab writeback


# ----------------------------- wrapper --------------------------------------
def decoder_forward(x, h, hs, params):
    """x: (T,B,O), h: (B,H), hs: (B,S,H). params = (w_slab, wo_slab)."""
    T, B, O = x.shape
    _, S, H = hs.shape
    w_slab, wo_slab = params

    full = lambda shape: pl.BlockSpec(shape, lambda i, _s=shape: tuple(0 for _ in _s))

    grid_spec = pltpu.PrefetchScalarGridSpec(
        num_scalar_prefetch=0,
        grid=(1,),                             # single invocation; recurrence is in-kernel
        in_specs=[
            full((T * B, O)),                  # x (packed .data layout, one DMA)
            full((B, H)),                      # h0
            full((B, S, H)),                   # hs (encoder states)
            full((O + H + 2, 4 * H)),          # [wx; wh; bx; bh] slab
            full((2 * H + 1, O)),              # [wo; bo] slab
        ],
        out_specs=full((T * B, O)),            # y written back as one slab
        scratch_shapes=[
            pltpu.VMEM((T, B, 4 * H), jnp.float32),   # GX (hoisted input matmul)
            pltpu.VMEM((T, B, H), jnp.float32),       # attn_t stash (deferred attention)
            pltpu.VMEM((T, B, H), jnp.float32),       # h_new stash (deferred output proj)
        ],
    )

    y_flat = pl.pallas_call(
        decoder_kernel,
        out_shape=jax.ShapeDtypeStruct((T * B, O), jnp.float32),
        grid_spec=grid_spec,
        compiler_params=pltpu.CompilerParams(
            dimension_semantics=("arbitrary",)),
    )(x.reshape(T * B, O), h, hs, w_slab, wo_slab)

    return y_flat.reshape(T, B, O)


# ----------------------------- pure-JAX reference ---------------------------
def decoder_reference(x, h, hs, raw):
    """Reference built directly from PyTorch-layout weights."""
    attn_W, attn_b, W_ih, W_hh, b_ih, b_hh, lino_W, lino_b = raw
    H = h.shape[-1]

    def step(hidden, x_t):
        attn = jnp.concatenate([hidden, x_t], axis=-1) @ attn_W.T + attn_b     # (B, H)
        scores = jnp.einsum('bsh,bh->bs', hs, attn)
        probs = jax.nn.softmax(scores, axis=-1)
        context = jnp.einsum('bs,bsh->bh', probs, hs)
        gi = x_t @ W_ih.T + b_ih
        gh = hidden @ W_hh.T + b_hh
        r = jax.nn.sigmoid(gi[:, :H] + gh[:, :H])
        z = jax.nn.sigmoid(gi[:, H:2 * H] + gh[:, H:2 * H])
        n = jnp.tanh(gi[:, 2 * H:] + r * gh[:, 2 * H:])
        h_new = (1.0 - z) * n + z * hidden
        logits = jnp.concatenate([context, h_new], axis=-1) @ lino_W.T + lino_b
        return h_new, jax.nn.log_softmax(logits, axis=-1)

    _, y = lax.scan(step, h, x)
    return y


# ----------------------------- main -----------------------------------------
if __name__ == "__main__":
    # Small shapes consistent with the module (hidden_size, output_size scaled down).
    T, B, S = 6, 4, 8          # decoder steps, batch, encoder sequence length
    H, O = 32, 16              # hidden_size, output_size

    key = jax.random.PRNGKey(0)
    keys = jax.random.split(key, 12)

    x = jax.random.uniform(keys[0], (T, B, O), jnp.float32)
    h = jax.random.normal(keys[1], (B, H), jnp.float32) * 0.1
    hs = jax.random.normal(keys[2], (B, S, H), jnp.float32) * 0.1

    # Deterministic parameter init (PyTorch-like uniform(-1/sqrt(fan_in), ...)).
    def uni(k, shape, fan_in):
        bound = 1.0 / jnp.sqrt(jnp.float32(fan_in))
        return jax.random.uniform(k, shape, jnp.float32, -bound, bound)

    attn_W = uni(keys[3], (H, H + O), H + O)      # nn.Linear(H+O, H).weight
    attn_b = uni(keys[4], (H,), H + O)
    W_ih = uni(keys[5], (3 * H, O), H)            # nn.GRUCell(O, H)
    W_hh = uni(keys[6], (3 * H, H), H)
    b_ih = uni(keys[7], (3 * H,), H)
    b_hh = uni(keys[8], (3 * H,), H)
    lino_W = uni(keys[9], (O, 2 * H), 2 * H)      # nn.Linear(2H, O)
    lino_b = uni(keys[10], (O,), 2 * H)

    raw = (attn_W, attn_b, W_ih, W_hh, b_ih, b_hh, lino_W, lino_b)

    # --- Fuse weights for the kernel (cat order of attn input: (hidden, inputs)). ---
    wa_h = attn_W[:, :H].T                         # (H, H)
    wa_x = attn_W[:, H:].T                         # (O, H)
    wir, wiz, win = (W_ih[:H].T, W_ih[H:2 * H].T, W_ih[2 * H:].T)     # (O, H) each
    whr, whz, whn = (W_hh[:H].T, W_hh[H:2 * H].T, W_hh[2 * H:].T)     # (H, H) each

    wx = jnp.concatenate([wa_x, wir, wiz, win], axis=1)               # (O, 4H)
    wh = jnp.concatenate([wa_h, whr, whz, whn], axis=1)               # (H, 4H)
    bx = jnp.concatenate([attn_b, b_ih]).reshape(1, 4 * H)            # (1, 4H)
    bh = jnp.concatenate([jnp.zeros((H,), jnp.float32), b_hh]).reshape(1, 4 * H)

    # Pack the 7 small operands into 2 DMA slabs.
    w_slab = jnp.concatenate([wx, wh, bx, bh], axis=0)                # (O+H+2, 4H)
    wo_slab = jnp.concatenate([lino_W.T, lino_b.reshape(1, O)], axis=0)  # (2H+1, O)

    params = (w_slab, wo_slab)

    y = decoder_forward(x, h, hs, params)
    y = jax.block_until_ready(y)

    y_ref = decoder_reference(x, h, hs, raw)
    # Exact softmax everywhere now -> tight tolerance (only MXU accumulation-order noise).
    assert jnp.allclose(y, y_ref, rtol=1e-4, atol=1e-4), "Pallas output mismatch vs reference"

    # Packed-sequence view of the output (batch_sizes == B for every step):
    _packed_y = y.reshape(T * B, O)  # == PackedSequence(...).data from the torch module

    print("KERNEL_OK")
</pallas_src>

<mosaic_0001>
module attributes {stable_mosaic.version = 11 : i64} {
  func.func @decoder_kernel(%arg0: i32, %arg1: memref<24x16xf32, #tpu.memory_space<vmem>>, %arg2: memref<4x32xf32, #tpu.memory_space<vmem>>, %arg3: memref<4x8x32xf32, #tpu.memory_space<vmem>>, %arg4: memref<50x128xf32, #tpu.memory_space<vmem>>, %arg5: memref<65x16xf32, #tpu.memory_space<vmem>>, %arg6: memref<24x16xf32, #tpu.memory_space<vmem>>, %arg7: memref<6x4x128xf32, #tpu.memory_space<vmem>>, %arg8: memref<6x4x32xf32, #tpu.memory_space<vmem>>, %arg9: memref<6x4x32xf32, #tpu.memory_space<vmem>>) attributes {dimension_semantics = [#tpu.dimension_semantics<arbitrary>], iteration_bounds = array<i64: 1>, scalar_prefetch = 0 : i64, scratch_operands = 3 : i64, tpu.core_type = #tpu.core_type<tc>, window_params = [{pipeline_mode = #tpu.pipeline_mode<synchronous>, transform_indices = @transform_0, window_bounds = array<i64: 24, 16>}, {pipeline_mode = #tpu.pipeline_mode<synchronous>, transform_indices = @transform_1, window_bounds = array<i64: 4, 32>}, {pipeline_mode = #tpu.pipeline_mode<synchronous>, transform_indices = @transform_2, window_bounds = array<i64: 4, 8, 32>}, {pipeline_mode = #tpu.pipeline_mode<synchronous>, transform_indices = @transform_3, window_bounds = array<i64: 50, 128>}, {pipeline_mode = #tpu.pipeline_mode<synchronous>, transform_indices = @transform_4, window_bounds = array<i64: 65, 16>}, {pipeline_mode = #tpu.pipeline_mode<synchronous>, transform_indices = @transform_5, window_bounds = array<i64: 24, 16>}]} {
    %c0 = arith.constant 0 : index
    %c0_0 = arith.constant 0 : index
    %0 = vector.load %arg4[%c0, %c0_0] : memref<50x128xf32, #tpu.memory_space<vmem>>, vector<50x128xf32>
    %1 = vector.extract_strided_slice %0 {offsets = [0, 0], sizes = [16, 128], strides = [1, 1]} : vector<50x128xf32> to vector<16x128xf32>
    %2 = vector.extract_strided_slice %0 {offsets = [16, 0], sizes = [32, 128], strides = [1, 1]} : vector<50x128xf32> to vector<32x128xf32>
    %3 = vector.extract_strided_slice %0 {offsets = [48, 0], sizes = [1, 128], strides = [1, 1]} : vector<50x128xf32> to vector<1x128xf32>
    %4 = vector.extract_strided_slice %0 {offsets = [49, 0], sizes = [1, 128], strides = [1, 1]} : vector<50x128xf32> to vector<1x128xf32>
    %c0_1 = arith.constant 0 : index
    %c0_2 = arith.constant 0 : index
    %5 = vector.load %arg5[%c0_1, %c0_2] : memref<65x16xf32, #tpu.memory_space<vmem>>, vector<65x16xf32>
    %6 = vector.extract_strided_slice %5 {offsets = [0, 0], sizes = [64, 16], strides = [1, 1]} : vector<65x16xf32> to vector<64x16xf32>
    %7 = vector.extract_strided_slice %5 {offsets = [64, 0], sizes = [1, 16], strides = [1, 1]} : vector<65x16xf32> to vector<1x16xf32>
    %c0_3 = arith.constant 0 : index
    %c0_4 = arith.constant 0 : index
    %8 = vector.load %arg1[%c0_3, %c0_4] : memref<24x16xf32, #tpu.memory_space<vmem>>, vector<24x16xf32>
    %cst = arith.constant dense<0.000000e+00> : vector<24x128xf32>
    %9 = tpu.matmul %8, %1, %cst {dimension_numbers = #tpu.dot_dimension_numbers<[1], [0], [0], [1], [0, 0, 1, 1], [], []>} : vector<24x16xf32>, vector<16x128xf32>, vector<24x128xf32> -> vector<24x128xf32>
    %10 = vector.broadcast %3 : vector<1x128xf32> to vector<24x128xf32>
    %11 = arith.addf %9, %10 : vector<24x128xf32>
    %12 = vector.shape_cast %11 : vector<24x128xf32> to vector<6x4x128xf32>
    %c0_5 = arith.constant 0 : index
    %c0_6 = arith.constant 0 : index
    %c0_7 = arith.constant 0 : index
    %13 = vector.load %arg7[%c0_5, %c0_6, %c0_7] : memref<6x4x128xf32, #tpu.memory_space<vmem>>, vector<6x4x128xf32>
    tpu.vector_store %arg7[%c0_5, %c0_6, %c0_7], %12 {strides = array<i32>} : memref<6x4x128xf32, #tpu.memory_space<vmem>>, vector<6x4x128xf32>,
    %c0_8 = arith.constant 0 : index
    %c0_9 = arith.constant 0 : index
    %14 = vector.load %arg2[%c0_8, %c0_9] : memref<4x32xf32, #tpu.memory_space<vmem>>, vector<4x32xf32>
    %c0_i32 = arith.constant 0 : i32
    %15 = arith.index_cast %c0_i32 : i32 to index
    %c0_10 = arith.constant 0 : index
    %c0_11 = arith.constant 0 : index
    %16 = vector.load %arg7[%15, %c0_10, %c0_11] : memref<6x4x128xf32, #tpu.memory_space<vmem>>, vector<1x4x128xf32>
    %17 = vector.shape_cast %16 : vector<1x4x128xf32> to vector<4x128xf32>
    %cst_12 = arith.constant dense<0.000000e+00> : vector<4x128xf32>
    %18 = tpu.matmul %14, %2, %cst_12 {dimension_numbers = #tpu.dot_dimension_numbers<[1], [0], [0], [1], [0, 0, 1, 1], [], []>} : vector<4x32xf32>, vector<32x128xf32>, vector<4x128xf32> -> vector<4x128xf32>
    %19 = vector.broadcast %4 : vector<1x128xf32> to vector<4x128xf32>
    %20 = arith.addf %18, %19 : vector<4x128xf32>
    %21 = vector.extract_strided_slice %17 {offsets = [0, 0], sizes = [4, 32], strides = [1, 1]} : vector<4x128xf32> to vector<4x32xf32>
    %22 = vector.extract_strided_slice %20 {offsets = [0, 0], sizes = [4, 32], strides = [1, 1]} : vector<4x128xf32> to vector<4x32xf32>
    %23 = arith.addf %21, %22 : vector<4x32xf32>
    %24 = arith.index_cast %c0_i32 : i32 to index
    %c0_13 = arith.constant 0 : index
    %c0_14 = arith.constant 0 : index
    %25 = vector.load %arg8[%24, %c0_13, %c0_14] : memref<6x4x32xf32, #tpu.memory_space<vmem>>, vector<1x4x32xf32>
    %26 = vector.shape_cast %25 : vector<1x4x32xf32> to vector<4x32xf32>
    %27 = vector.shape_cast %23 : vector<4x32xf32> to vector<1x4x32xf32>
    tpu.vector_store %arg8[%24, %c0_13, %c0_14], %27 {strides = array<i32>} : memref<6x4x32xf32, #tpu.memory_space<vmem>>, vector<1x4x32xf32>,
    %28 = vector.extract_strided_slice %17 {offsets = [0, 32], sizes = [4, 32], strides = [1, 1]} : vector<4x128xf32> to vector<4x32xf32>
    %29 = vector.extract_strided_slice %20 {offsets = [0, 32], sizes = [4, 32], strides = [1, 1]} : vector<4x128xf32> to vector<4x32xf32>
    %30 = arith.addf %28, %29 : vector<4x32xf32>
    %31 = arith.negf %30 : vector<4x32xf32>
    %32 = math.exp %31 : vector<4x32xf32>
    %cst_15 = arith.constant 1.000000e+00 : f32
    %33 = vector.broadcast %cst_15 : f32 to vector<4x32xf32>
    %34 = arith.addf %33, %32 : vector<4x32xf32>
    %35 = arith.divf %33, %34 : vector<4x32xf32>
    %36 = vector.extract_strided_slice %17 {offsets = [0, 64], sizes = [4, 32], strides = [1, 1]} : vector<4x128xf32> to vector<4x32xf32>
    %37 = vector.extract_strided_slice %20 {offsets = [0, 64], sizes = [4, 32], strides = [1, 1]} : vector<4x128xf32> to vector<4x32xf32>
    %38 = arith.addf %36, %37 : vector<4x32xf32>
    %39 = arith.negf %38 : vector<4x32xf32>
    %40 = math.exp %39 : vector<4x32xf32>
    %cst_16 = arith.constant 1.000000e+00 : f32
    %41 = vector.broadcast %cst_16 : f32 to vector<4x32xf32>
    %42 = arith.addf %41, %40 : vector<4x32xf32>
    %43 = arith.divf %41, %42 : vector<4x32xf32>
    %44 = vector.extract_strided_slice %17 {offsets = [0, 96], sizes = [4, 32], strides = [1, 1]} : vector<4x128xf32> to vector<4x32xf32>
    %45 = vector.extract_strided_slice %20 {offsets = [0, 96], sizes = [4, 32], strides = [1, 1]} : vector<4x128xf32> to vector<4x32xf32>
    %46 = arith.mulf %35, %45 : vector<4x32xf32>
    %47 = arith.addf %44, %46 : vector<4x32xf32>
    %48 = math.tanh %47 : vector<4x32xf32>
    %cst_17 = arith.constant 1.000000e+00 : f32
    %49 = vector.broadcast %cst_17 : f32 to vector<4x32xf32>
    %50 = arith.subf %49, %43 : vector<4x32xf32>
    %51 = arith.mulf %50, %48 : vector<4x32xf32>
    %52 = arith.mulf %43, %14 : vector<4x32xf32>
    %53 = arith.addf %51, %52 : vector<4x32xf32>
    %54 = arith.index_cast %c0_i32 : i32 to index
    %c0_18 = arith.constant 0 : index
    %c0_19 = arith.constant 0 : index
    %55 = vector.load %arg9[%54, %c0_18, %c0_19] : memref<6x4x32xf32, #tpu.memory_space<vmem>>, vector<1x4x32xf32>
    %56 = vector.shape_cast %55 : vector<1x4x32xf32> to vector<4x32xf32>
    %57 = vector.shape_cast %53 : vector<4x32xf32> to vector<1x4x32xf32>
    tpu.vector_store %arg9[%54, %c0_18, %c0_19], %57 {strides = array<i32>} : memref<6x4x32xf32, #tpu.memory_space<vmem>>, vector<1x4x32xf32>,
    %c1_i32 = arith.constant 1 : i32
    %58 = arith.index_cast %c1_i32 : i32 to index
    %c0_20 = arith.constant 0 : index
    %c0_21 = arith.constant 0 : index
    %59 = vector.load %arg7[%58, %c0_20, %c0_21] : memref<6x4x128xf32, #tpu.memory_space<vmem>>, vector<1x4x128xf32>
    %60 = vector.shape_cast %59 : vector<1x4x128xf32> to vector<4x128xf32>
    %cst_22 = arith.constant dense<0.000000e+00> : vector<4x128xf32>
    %61 = tpu.matmul %53, %2, %cst_22 {dimension_numbers = #tpu.dot_dimension_numbers<[1], [0], [0], [1], [0, 0, 1, 1], [], []>} : vector<4x32xf32>, vector<32x128xf32>, vector<4x128xf32> -> vector<4x128xf32>
    %62 = vector.broadcast %4 : vector<1x128xf32> to vector<4x128xf32>
    %63 = arith.addf %61, %62 : vector<4x128xf32>
    %64 = vector.extract_strided_slice %60 {offsets = [0, 0], sizes = [4, 32], strides = [1, 1]} : vector<4x128xf32> to vector<4x32xf32>
    %65 = vector.extract_strided_slice %63 {offsets = [0, 0], sizes = [4, 32], strides = [1, 1]} : vector<4x128xf32> to vector<4x32xf32>
    %66 = arith.addf %64, %65 : vector<4x32xf32>
    %67 = arith.index_cast %c1_i32 : i32 to index
    %c0_23 = arith.constant 0 : index
    %c0_24 = arith.constant 0 : index
    %68 = vector.load %arg8[%67, %c0_23, %c0_24] : memref<6x4x32xf32, #tpu.memory_space<vmem>>, vector<1x4x32xf32>
    %69 = vector.shape_cast %68 : vector<1x4x32xf32> to vector<4x32xf32>
    %70 = vector.shape_cast %66 : vector<4x32xf32> to vector<1x4x32xf32>
    tpu.vector_store %arg8[%67, %c0_23, %c0_24], %70 {strides = array<i32>} : memref<6x4x32xf32, #tpu.memory_space<vmem>>, vector<1x4x32xf32>,
    %71 = vector.extract_strided_slice %60 {offsets = [0, 32], sizes = [4, 32], strides = [1, 1]} : vector<4x128xf32> to vector<4x32xf32>
    %72 = vector.extract_strided_slice %63 {offsets = [0, 32], sizes = [4, 32], strides = [1, 1]} : vector<4x128xf32> to vector<4x32xf32>
    %73 = arith.addf %71, %72 : vector<4x32xf32>
    %74 = arith.negf %73 : vector<4x32xf32>
    %75 = math.exp %74 : vector<4x32xf32>
    %cst_25 = arith.constant 1.000000e+00 : f32
    %76 = vector.broadcast %cst_25 : f32 to vector<4x32xf32>
    %77 = arith.addf %76, %75 : vector<4x32xf32>
    %78 = arith.divf %76, %77 : vector<4x32xf32>
    %79 = vector.extract_strided_slice %60 {offsets = [0, 64], sizes = [4, 32], strides = [1, 1]} : vector<4x128xf32> to vector<4x32xf32>
    %80 = vector.extract_strided_slice %63 {offsets = [0, 64], sizes = [4, 32], strides = [1, 1]} : vector<4x128xf32> to vector<4x32xf32>
    %81 = arith.addf %79, %80 : vector<4x32xf32>
    %82 = arith.negf %81 : vector<4x32xf32>
    %83 = math.exp %82 : vector<4x32xf32>
    %cst_26 = arith.constant 1.000000e+00 : f32
    %84 = vector.broadcast %cst_26 : f32 to vector<4x32xf32>
    %85 = arith.addf %84, %83 : vector<4x32xf32>
    %86 = arith.divf %84, %85 : vector<4x32xf32>
    %87 = vector.extract_strided_slice %60 {offsets = [0, 96], sizes = [4, 32], strides = [1, 1]} : vector<4x128xf32> to vector<4x32xf32>
    %88 = vector.extract_strided_slice %63 {offsets = [0, 96], sizes = [4, 32], strides = [1, 1]} : vector<4x128xf32> to vector<4x32xf32>
    %89 = arith.mulf %78, %88 : vector<4x32xf32>
    %90 = arith.addf %87, %89 : vector<4x32xf32>
    %91 = math.tanh %90 : vector<4x32xf32>
    %cst_27 = arith.constant 1.000000e+00 : f32
    %92 = vector.broadcast %cst_27 : f32 to vector<4x32xf32>
    %93 = arith.subf %92, %86 : vector<4x32xf32>
    %94 = arith.mulf %93, %91 : vector<4x32xf32>
    %95 = arith.mulf %86, %53 : vector<4x32xf32>
    %96 = arith.addf %94, %95 : vector<4x32xf32>
    %97 = arith.index_cast %c1_i32 : i32 to index
    %c0_28 = arith.constant 0 : index
    %c0_29 = arith.constant 0 : index
    %98 = vector.load %arg9[%97, %c0_28, %c0_29] : memref<6x4x32xf32, #tpu.memory_space<vmem>>, vector<1x4x32xf32>
    %99 = vector.shape_cast %98 : vector<1x4x32xf32> to vector<4x32xf32>
    %100 = vector.shape_cast %96 : vector<4x32xf32> to vector<1x4x32xf32>
    tpu.vector_store %arg9[%97, %c0_28, %c0_29], %100 {strides = array<i32>} : memref<6x4x32xf32, #tpu.memory_space<vmem>>, vector<1x4x32xf32>,
    %c2_i32 = arith.constant 2 : i32
    %101 = arith.index_cast %c2_i32 : i32 to index
    %c0_30 = arith.constant 0 : index
    %c0_31 = arith.constant 0 : index
    %102 = vector.load %arg7[%101, %c0_30, %c0_31] : memref<6x4x128xf32, #tpu.memory_space<vmem>>, vector<1x4x128xf32>
    %103 = vector.shape_cast %102 : vector<1x4x128xf32> to vector<4x128xf32>
    %cst_32 = arith.constant dense<0.000000e+00> : vector<4x128xf32>
    %104 = tpu.matmul %96, %2, %cst_32 {dimension_numbers = #tpu.dot_dimension_numbers<[1], [0], [0], [1], [0, 0, 1, 1], [], []>} : vector<4x32xf32>, vector<32x128xf32>, vector<4x128xf32> -> vector<4x128xf32>
    %105 = vector.broadcast %4 : vector<1x128xf32> to vector<4x128xf32>
    %106 = arith.addf %104, %105 : vector<4x128xf32>
    %107 = vector.extract_strided_slice %103 {offsets = [0, 0], sizes = [4, 32], strides = [1, 1]} : vector<4x128xf32> to vector<4x32xf32>
    %108 = vector.extract_strided_slice %106 {offsets = [0, 0], sizes = [4, 32], strides = [1, 1]} : vector<4x128xf32> to vector<4x32xf32>
    %109 = arith.addf %107, %108 : vector<4x32xf32>
    %110 = arith.index_cast %c2_i32 : i32 to index
    %c0_33 = arith.constant 0 : index
    %c0_34 = arith.constant 0 : index
    %111 = vector.load %arg8[%110, %c0_33, %c0_34] : memref<6x4x32xf32, #tpu.memory_space<vmem>>, vector<1x4x32xf32>
    %112 = vector.shape_cast %111 : vector<1x4x32xf32> to vector<4x32xf32>
    %113 = vector.shape_cast %109 : vector<4x32xf32> to vector<1x4x32xf32>
    tpu.vector_store %arg8[%110, %c0_33, %c0_34], %113 {strides = array<i32>} : memref<6x4x32xf32, #tpu.memory_space<vmem>>, vector<1x4x32xf32>,
    %114 = vector.extract_strided_slice %103 {offsets = [0, 32], sizes = [4, 32], strides = [1, 1]} : vector<4x128xf32> to vector<4x32xf32>
    %115 = vector.extract_strided_slice %106 {offsets = [0, 32], sizes = [4, 32], strides = [1, 1]} : vector<4x128xf32> to vector<4x32xf32>
    %116 = arith.addf %114, %115 : vector<4x32xf32>
    %117 = arith.negf %116 : vector<4x32xf32>
    %118 = math.exp %117 : vector<4x32xf32>
    %cst_35 = arith.constant 1.000000e+00 : f32
    %119 = vector.broadcast %cst_35 : f32 to vector<4x32xf32>
    %120 = arith.addf %119, %118 : vector<4x32xf32>
    %121 = arith.divf %119, %120 : vector<4x32xf32>
    %122 = vector.extract_strided_slice %103 {offsets = [0, 64], sizes = [4, 32], strides = [1, 1]} : vector<4x128xf32> to vector<4x32xf32>
    %123 = vector.extract_strided_slice %106 {offsets = [0, 64], sizes = [4, 32], strides = [1, 1]} : vector<4x128xf32> to vector<4x32xf32>
    %124 = arith.addf %122, %123 : vector<4x32xf32>
    %125 = arith.negf %124 : vector<4x32xf32>
    %126 = math.exp %125 : vector<4x32xf32>
    %cst_36 = arith.constant 1.000000e+00 : f32
    %127 = vector.broadcast %cst_36 : f32 to vector<4x32xf32>
    %128 = arith.addf %127, %126 : vector<4x32xf32>
    %129 = arith.divf %127, %128 : vector<4x32xf32>
    %130 = vector.extract_strided_slice %103 {offsets = [0, 96], sizes = [4, 32], strides = [1, 1]} : vector<4x128xf32> to vector<4x32xf32>
    %131 = vector.extract_strided_slice %106 {offsets = [0, 96], sizes = [4, 32], strides = [1, 1]} : vector<4x128xf32> to vector<4x32xf32>
    %132 = arith.mulf %121, %131 : vector<4x32xf32>
    %133 = arith.addf %130, %132 : vector<4x32xf32>
    %134 = math.tanh %133 : vector<4x32xf32>
    %cst_37 = arith.constant 1.000000e+00 : f32
    %135 = vector.broadcast %cst_37 : f32 to vector<4x32xf32>
    %136 = arith.subf %135, %129 : vector<4x32xf32>
    %137 = arith.mulf %136, %134 : vector<4x32xf32>
    %138 = arith.mulf %129, %96 : vector<4x32xf32>
    %139 = arith.addf %137, %138 : vector<4x32xf32>
    %140 = arith.index_cast %c2_i32 : i32 to index
    %c0_38 = arith.constant 0 : index
    %c0_39 = arith.constant 0 : index
    %141 = vector.load %arg9[%140, %c0_38, %c0_39] : memref<6x4x32xf32, #tpu.memory_space<vmem>>, vector<1x4x32xf32>
    %142 = vector.shape_cast %141 : vector<1x4x32xf32> to vector<4x32xf32>
    %143 = vector.shape_cast %139 : vector<4x32xf32> to vector<1x4x32xf32>
    tpu.vector_store %arg9[%140, %c0_38, %c0_39], %143 {strides = array<i32>} : memref<6x4x32xf32, #tpu.memory_space<vmem>>, vector<1x4x32xf32>,
    %c3_i32 = arith.constant 3 : i32
    %144 = arith.index_cast %c3_i32 : i32 to index
    %c0_40 = arith.constant 0 : index
    %c0_41 = arith.constant 0 : index
    %145 = vector.load %arg7[%144, %c0_40, %c0_41] : memref<6x4x128xf32, #tpu.memory_space<vmem>>, vector<1x4x128xf32>
    %146 = vector.shape_cast %145 : vector<1x4x128xf32> to vector<4x128xf32>
    %cst_42 = arith.constant dense<0.000000e+00> : vector<4x128xf32>
    %147 = tpu.matmul %139, %2, %cst_42 {dimension_numbers = #tpu.dot_dimension_numbers<[1], [0], [0], [1], [0, 0, 1, 1], [], []>} : vector<4x32xf32>, vector<32x128xf32>, vector<4x128xf32> -> vector<4x128xf32>
    %148 = vector.broadcast %4 : vector<1x128xf32> to vector<4x128xf32>
    %149 = arith.addf %147, %148 : vector<4x128xf32>
    %150 = vector.extract_strided_slice %146 {offsets = [0, 0], sizes = [4, 32], strides = [1, 1]} : vector<4x128xf32> to vector<4x32xf32>
    %151 = vector.extract_strided_slice %149 {offsets = [0, 0], sizes = [4, 32], strides = [1, 1]} : vector<4x128xf32> to vector<4x32xf32>
    %152 = arith.addf %150, %151 : vector<4x32xf32>
    %153 = arith.index_cast %c3_i32 : i32 to index
    %c0_43 = arith.constant 0 : index
    %c0_44 = arith.constant 0 : index
    %154 = vector.load %arg8[%153, %c0_43, %c0_44] : memref<6x4x32xf32, #tpu.memory_space<vmem>>, vector<1x4x32xf32>
    %155 = vector.shape_cast %154 : vector<1x4x32xf32> to vector<4x32xf32>
    %156 = vector.shape_cast %152 : vector<4x32xf32> to vector<1x4x32xf32>
    tpu.vector_store %arg8[%153, %c0_43, %c0_44], %156 {strides = array<i32>} : memref<6x4x32xf32, #tpu.memory_space<vmem>>, vector<1x4x32xf32>,
    %157 = vector.extract_strided_slice %146 {offsets = [0, 32], sizes = [4, 32], strides = [1, 1]} : vector<4x128xf32> to vector<4x32xf32>
    %158 = vector.extract_strided_slice %149 {offsets = [0, 32], sizes = [4, 32], strides = [1, 1]} : vector<4x128xf32> to vector<4x32xf32>
    %159 = arith.addf %157, %158 : vector<4x32xf32>
    %160 = arith.negf %159 : vector<4x32xf32>
    %161 = math.exp %160 : vector<4x32xf32>
    %cst_45 = arith.constant 1.000000e+00 : f32
    %162 = vector.broadcast %cst_45 : f32 to vector<4x32xf32>
    %163 = arith.addf %162, %161 : vector<4x32xf32>
    %164 = arith.divf %162, %163 : vector<4x32xf32>
    %165 = vector.extract_strided_slice %146 {offsets = [0, 64], sizes = [4, 32], strides = [1, 1]} : vector<4x128xf32> to vector<4x32xf32>
    %166 = vector.extract_strided_slice %149 {offsets = [0, 64], sizes = [4, 32], strides = [1, 1]} : vector<4x128xf32> to vector<4x32xf32>
    %167 = arith.addf %165, %166 : vector<4x32xf32>
    %168 = arith.negf %167 : vector<4x32xf32>
    %169 = math.exp %168 : vector<4x32xf32>
    %cst_46 = arith.constant 1.000000e+00 : f32
    %170 = vector.broadcast %cst_46 : f32 to vector<4x32xf32>
    %171 = arith.addf %170, %169 : vector<4x32xf32>
    %172 = arith.divf %170, %171 : vector<4x32xf32>
    %173 = vector.extract_strided_slice %146 {offsets = [0, 96], sizes = [4, 32], strides = [1, 1]} : vector<4x128xf32> to vector<4x32xf32>
    %174 = vector.extract_strided_slice %149 {offsets = [0, 96], sizes = [4, 32], strides = [1, 1]} : vector<4x128xf32> to vector<4x32xf32>
    %175 = arith.mulf %164, %174 : vector<4x32xf32>
    %176 = arith.addf %173, %175 : vector<4x32xf32>
    %177 = math.tanh %176 : vector<4x32xf32>
    %cst_47 = arith.constant 1.000000e+00 : f32
    %178 = vector.broadcast %cst_47 : f32 to vector<4x32xf32>
    %179 = arith.subf %178, %172 : vector<4x32xf32>
    %180 = arith.mulf %179, %177 : vector<4x32xf32>
    %181 = arith.mulf %172, %139 : vector<4x32xf32>
    %182 = arith.addf %180, %181 : vector<4x32xf32>
    %183 = arith.index_cast %c3_i32 : i32 to index
    %c0_48 = arith.constant 0 : index
    %c0_49 = arith.constant 0 : index
    %184 = vector.load %arg9[%183, %c0_48, %c0_49] : memref<6x4x32xf32, #tpu.memory_space<vmem>>, vector<1x4x32xf32>
    %185 = vector.shape_cast %184 : vector<1x4x32xf32> to vector<4x32xf32>
    %186 = vector.shape_cast %182 : vector<4x32xf32> to vector<1x4x32xf32>
    tpu.vector_store %arg9[%183, %c0_48, %c0_49], %186 {strides = array<i32>} : memref<6x4x32xf32, #tpu.memory_space<vmem>>, vector<1x4x32xf32>,
    %c4_i32 = arith.constant 4 : i32
    %187 = arith.index_cast %c4_i32 : i32 to index
    %c0_50 = arith.constant 0 : index
    %c0_51 = arith.constant 0 : index
    %188 = vector.load %arg7[%187, %c0_50, %c0_51] : memref<6x4x128xf32, #tpu.memory_space<vmem>>, vector<1x4x128xf32>
    %189 = vector.shape_cast %188 : vector<1x4x128xf32> to vector<4x128xf32>
    %cst_52 = arith.constant dense<0.000000e+00> : vector<4x128xf32>
    %190 = tpu.matmul %182, %2, %cst_52 {dimension_numbers = #tpu.dot_dimension_numbers<[1], [0], [0], [1], [0, 0, 1, 1], [], []>} : vector<4x32xf32>, vector<32x128xf32>, vector<4x128xf32> -> vector<4x128xf32>
    %191 = vector.broadcast %4 : vector<1x128xf32> to vector<4x128xf32>
    %192 = arith.addf %190, %191 : vector<4x128xf32>
    %193 = vector.extract_strided_slice %189 {offsets = [0, 0], sizes = [4, 32], strides = [1, 1]} : vector<4x128xf32> to vector<4x32xf32>
    %194 = vector.extract_strided_slice %192 {offsets = [0, 0], sizes = [4, 32], strides = [1, 1]} : vector<4x128xf32> to vector<4x32xf32>
    %195 = arith.addf %193, %194 : vector<4x32xf32>
    %196 = arith.index_cast %c4_i32 : i32 to index
    %c0_53 = arith.constant 0 : index
    %c0_54 = arith.constant 0 : index
    %197 = vector.load %arg8[%196, %c0_53, %c0_54] : memref<6x4x32xf32, #tpu.memory_space<vmem>>, vector<1x4x32xf32>
    %198 = vector.shape_cast %197 : vector<1x4x32xf32> to vector<4x32xf32>
    %199 = vector.shape_cast %195 : vector<4x32xf32> to vector<1x4x32xf32>
    tpu.vector_store %arg8[%196, %c0_53, %c0_54], %199 {strides = array<i32>} : memref<6x4x32xf32, #tpu.memory_space<vmem>>, vector<1x4x32xf32>,
    %200 = vector.extract_strided_slice %189 {offsets = [0, 32], sizes = [4, 32], strides = [1, 1]} : vector<4x128xf32> to vector<4x32xf32>
    %201 = vector.extract_strided_slice %192 {offsets = [0, 32], sizes = [4, 32], strides = [1, 1]} : vector<4x128xf32> to vector<4x32xf32>
    %202 = arith.addf %200, %201 : vector<4x32xf32>
    %203 = arith.negf %202 : vector<4x32xf32>
    %204 = math.exp %203 : vector<4x32xf32>
    %cst_55 = arith.constant 1.000000e+00 : f32
    %205 = vector.broadcast %cst_55 : f32 to vector<4x32xf32>
    %206 = arith.addf %205, %204 : vector<4x32xf32>
    %207 = arith.divf %205, %206 : vector<4x32xf32>
    %208 = vector.extract_strided_slice %189 {offsets = [0, 64], sizes = [4, 32], strides = [1, 1]} : vector<4x128xf32> to vector<4x32xf32>
    %209 = vector.extract_strided_slice %192 {offsets = [0, 64], sizes = [4, 32], strides = [1, 1]} : vector<4x128xf32> to vector<4x32xf32>
    %210 = arith.addf %208, %209 : vector<4x32xf32>
    %211 = arith.negf %210 : vector<4x32xf32>
    %212 = math.exp %211 : vector<4x32xf32>
    %cst_56 = arith.constant 1.000000e+00 : f32
    %213 = vector.broadcast %cst_56 : f32 to vector<4x32xf32>
    %214 = arith.addf %213, %212 : vector<4x32xf32>
    %215 = arith.divf %213, %214 : vector<4x32xf32>
    %216 = vector.extract_strided_slice %189 {offsets = [0, 96], sizes = [4, 32], strides = [1, 1]} : vector<4x128xf32> to vector<4x32xf32>
    %217 = vector.extract_strided_slice %192 {offsets = [0, 96], sizes = [4, 32], strides = [1, 1]} : vector<4x128xf32> to vector<4x32xf32>
    %218 = arith.mulf %207, %217 : vector<4x32xf32>
    %219 = arith.addf %216, %218 : vector<4x32xf32>
    %220 = math.tanh %219 : vector<4x32xf32>
    %cst_57 = arith.constant 1.000000e+00 : f32
    %221 = vector.broadcast %cst_57 : f32 to vector<4x32xf32>
    %222 = arith.subf %221, %215 : vector<4x32xf32>
    %223 = arith.mulf %222, %220 : vector<4x32xf32>
    %224 = arith.mulf %215, %182 : vector<4x32xf32>
    %225 = arith.addf %223, %224 : vector<4x32xf32>
    %226 = arith.index_cast %c4_i32 : i32 to index
    %c0_58 = arith.constant 0 : index
    %c0_59 = arith.constant 0 : index
    %227 = vector.load %arg9[%226, %c0_58, %c0_59] : memref<6x4x32xf32, #tpu.memory_space<vmem>>, vector<1x4x32xf32>
    %228 = vector.shape_cast %227 : vector<1x4x32xf32> to vector<4x32xf32>
    %229 = vector.shape_cast %225 : vector<4x32xf32> to vector<1x4x32xf32>
    tpu.vector_store %arg9[%226, %c0_58, %c0_59], %229 {strides = array<i32>} : memref<6x4x32xf32, #tpu.memory_space<vmem>>, vector<1x4x32xf32>,
    %c5_i32 = arith.constant 5 : i32
    %230 = arith.index_cast %c5_i32 : i32 to index
    %c0_60 = arith.constant 0 : index
    %c0_61 = arith.constant 0 : index
    %231 = vector.load %arg7[%230, %c0_60, %c0_61] : memref<6x4x128xf32, #tpu.memory_space<vmem>>, vector<1x4x128xf32>
    %232 = vector.shape_cast %231 : vector<1x4x128xf32> to vector<4x128xf32>
    %cst_62 = arith.constant dense<0.000000e+00> : vector<4x128xf32>
    %233 = tpu.matmul %225, %2, %cst_62 {dimension_numbers = #tpu.dot_dimension_numbers<[1], [0], [0], [1], [0, 0, 1, 1], [], []>} : vector<4x32xf32>, vector<32x128xf32>, vector<4x128xf32> -> vector<4x128xf32>
    %234 = vector.broadcast %4 : vector<1x128xf32> to vector<4x128xf32>
    %235 = arith.addf %233, %234 : vector<4x128xf32>
    %236 = vector.extract_strided_slice %232 {offsets = [0, 0], sizes = [4, 32], strides = [1, 1]} : vector<4x128xf32> to vector<4x32xf32>
    %237 = vector.extract_strided_slice %235 {offsets = [0, 0], sizes = [4, 32], strides = [1, 1]} : vector<4x128xf32> to vector<4x32xf32>
    %238 = arith.addf %236, %237 : vector<4x32xf32>
    %239 = arith.index_cast %c5_i32 : i32 to index
    %c0_63 = arith.constant 0 : index
    %c0_64 = arith.constant 0 : index
    %240 = vector.load %arg8[%239, %c0_63, %c0_64] : memref<6x4x32xf32, #tpu.memory_space<vmem>>, vector<1x4x32xf32>
    %241 = vector.shape_cast %240 : vector<1x4x32xf32> to vector<4x32xf32>
    %242 = vector.shape_cast %238 : vector<4x32xf32> to vector<1x4x32xf32>
    tpu.vector_store %arg8[%239, %c0_63, %c0_64], %242 {strides = array<i32>} : memref<6x4x32xf32, #tpu.memory_space<vmem>>, vector<1x4x32xf32>,
    %243 = vector.extract_strided_slice %232 {offsets = [0, 32], sizes = [4, 32], strides = [1, 1]} : vector<4x128xf32> to vector<4x32xf32>
    %244 = vector.extract_strided_slice %235 {offsets = [0, 32], sizes = [4, 32], strides = [1, 1]} : vector<4x128xf32> to vector<4x32xf32>
    %245 = arith.addf %243, %244 : vector<4x32xf32>
    %246 = arith.negf %245 : vector<4x32xf32>
    %247 = math.exp %246 : vector<4x32xf32>
    %cst_65 = arith.constant 1.000000e+00 : f32
    %248 = vector.broadcast %cst_65 : f32 to vector<4x32xf32>
    %249 = arith.addf %248, %247 : vector<4x32xf32>
    %250 = arith.divf %248, %249 : vector<4x32xf32>
    %251 = vector.extract_strided_slice %232 {offsets = [0, 64], sizes = [4, 32], strides = [1, 1]} : vector<4x128xf32> to vector<4x32xf32>
    %252 = vector.extract_strided_slice %235 {offsets = [0, 64], sizes = [4, 32], strides = [1, 1]} : vector<4x128xf32> to vector<4x32xf32>
    %253 = arith.addf %251, %252 : vector<4x32xf32>
    %254 = arith.negf %253 : vector<4x32xf32>
    %255 = math.exp %254 : vector<4x32xf32>
    %cst_66 = arith.constant 1.000000e+00 : f32
    %256 = vector.broadcast %cst_66 : f32 to vector<4x32xf32>
    %257 = arith.addf %256, %255 : vector<4x32xf32>
    %258 = arith.divf %256, %257 : vector<4x32xf32>
    %259 = vector.extract_strided_slice %232 {offsets = [0, 96], sizes = [4, 32], strides = [1, 1]} : vector<4x128xf32> to vector<4x32xf32>
    %260 = vector.extract_strided_slice %235 {offsets = [0, 96], sizes = [4, 32], strides = [1, 1]} : vector<4x128xf32> to vector<4x32xf32>
    %261 = arith.mulf %250, %260 : vector<4x32xf32>
    %262 = arith.addf %259, %261 : vector<4x32xf32>
    %263 = math.tanh %262 : vector<4x32xf32>
    %cst_67 = arith.constant 1.000000e+00 : f32
    %264 = vector.broadcast %cst_67 : f32 to vector<4x32xf32>
    %265 = arith.subf %264, %258 : vector<4x32xf32>
    %266 = arith.mulf %265, %263 : vector<4x32xf32>
    %267 = arith.mulf %258, %225 : vector<4x32xf32>
    %268 = arith.addf %266, %267 : vector<4x32xf32>
    %269 = arith.index_cast %c5_i32 : i32 to index
    %c0_68 = arith.constant 0 : index
    %c0_69 = arith.constant 0 : index
    %270 = vector.load %arg9[%269, %c0_68, %c0_69] : memref<6x4x32xf32, #tpu.memory_space<vmem>>, vector<1x4x32xf32>
    %271 = vector.shape_cast %270 : vector<1x4x32xf32> to vector<4x32xf32>
    %272 = vector.shape_cast %268 : vector<4x32xf32> to vector<1x4x32xf32>
    tpu.vector_store %arg9[%269, %c0_68, %c0_69], %272 {strides = array<i32>} : memref<6x4x32xf32, #tpu.memory_space<vmem>>, vector<1x4x32xf32>,
    %c6_i32 = arith.constant 6 : i32
    %c0_70 = arith.constant 0 : index
    %c0_71 = arith.constant 0 : index
    %c0_72 = arith.constant 0 : index
    %273 = vector.load %arg3[%c0_70, %c0_71, %c0_72] : memref<4x8x32xf32, #tpu.memory_space<vmem>>, vector<4x8x32xf32>
    %c0_73 = arith.constant 0 : index
    %c0_74 = arith.constant 0 : index
    %c0_75 = arith.constant 0 : index
    %274 = vector.load %arg8[%c0_73, %c0_74, %c0_75] : memref<6x4x32xf32, #tpu.memory_space<vmem>>, vector<6x4x32xf32>
    %c0_76 = arith.constant 0 : index
    %c0_77 = arith.constant 0 : index
    %c0_78 = arith.constant 0 : index
    %275 = vector.load %arg9[%c0_76, %c0_77, %c0_78] : memref<6x4x32xf32, #tpu.memory_space<vmem>>, vector<6x4x32xf32>
    "tpu.trace_start"() <{level = 10 : i32, message = "tbh,bsh->tbs"}> : () -> ()
    %cst_79 = arith.constant dense<0.000000e+00> : vector<4x8x6xf32>
    %276 = tpu.matmul %273, %274, %cst_79 {dimension_numbers = #tpu.dot_dimension_numbers<[2], [2], [1], [0], [0, 0, 0, 1, 1, 0], [0], [1]>} : vector<4x8x32xf32>, vector<6x4x32xf32>, vector<4x8x6xf32> -> vector<4x8x6xf32>
    %277 = tpu.transpose %276, [2, 0, 1] : vector<4x8x6xf32> -> vector<6x4x8xf32>
    "tpu.trace_stop"() : () -> ()
    %cst_80 = arith.constant dense<0xFF800000> : vector<6x4xf32>
    %278 = vector.multi_reduction <maximumf>, %277, %cst_80 [2] : vector<6x4x8xf32> to vector<6x4xf32>
    %279 = vector.shape_cast %278 : vector<6x4xf32> to vector<6x4x1xf32>
    %280 = vector.broadcast %279 : vector<6x4x1xf32> to vector<6x4x8xf32>
    %281 = arith.subf %277, %280 : vector<6x4x8xf32>
    %282 = math.exp %281 : vector<6x4x8xf32>
    %cst_81 = arith.constant dense<0.000000e+00> : vector<6x4xf32>
    %283 = vector.multi_reduction <add>, %282, %cst_81 [2] : vector<6x4x8xf32> to vector<6x4xf32>
    %284 = vector.shape_cast %283 : vector<6x4xf32> to vector<6x4x1xf32>
    %285 = vector.broadcast %284 : vector<6x4x1xf32> to vector<6x4x8xf32>
    %286 = arith.divf %282, %285 : vector<6x4x8xf32>
    "tpu.trace_start"() <{level = 10 : i32, message = "tbs,bsh->tbh"}> : () -> ()
    %cst_82 = arith.constant dense<0.000000e+00> : vector<4x32x6xf32>
    %287 = tpu.matmul %273, %286, %cst_82 {dimension_numbers = #tpu.dot_dimension_numbers<[1], [2], [2], [0], [0, 0, 0, 2, 1, 0], [0], [1]>} : vector<4x8x32xf32>, vector<6x4x8xf32>, vector<4x32x6xf32> -> vector<4x32x6xf32>
    %288 = tpu.transpose %287, [2, 0, 1] : vector<4x32x6xf32> -> vector<6x4x32xf32>
    "tpu.trace_stop"() : () -> ()
    %289 = tpu.concatenate %288, %275 in 2 : vector<6x4x32xf32>, vector<6x4x32xf32> -> vector<6x4x64xf32>
    %290 = vector.shape_cast %289 : vector<6x4x64xf32> to vector<24x64xf32>
    %cst_83 = arith.constant dense<0.000000e+00> : vector<24x16xf32>
    %291 = tpu.matmul %290, %6, %cst_83 {dimension_numbers = #tpu.dot_dimension_numbers<[1], [0], [0], [1], [0, 0, 1, 1], [], []>} : vector<24x64xf32>, vector<64x16xf32>, vector<24x16xf32> -> vector<24x16xf32>
    %292 = vector.broadcast %7 : vector<1x16xf32> to vector<24x16xf32>
    %293 = arith.addf %291, %292 : vector<24x16xf32>
    %cst_84 = arith.constant dense<0xFF800000> : vector<24xf32>
    %294 = vector.multi_reduction <maximumf>, %293, %cst_84 [1] : vector<24x16xf32> to vector<24xf32>
    %295 = vector.shape_cast %294 : vector<24xf32> to vector<24x1xf32>
    %296 = vector.broadcast %295 : vector<24x1xf32> to vector<24x16xf32>
    %297 = arith.subf %293, %296 : vector<24x16xf32>
    %298 = math.exp %297 : vector<24x16xf32>
    %cst_85 = arith.constant dense<0.000000e+00> : vector<24xf32>
    %299 = vector.multi_reduction <add>, %298, %cst_85 [1] : vector<24x16xf32> to vector<24xf32>
    %300 = vector.shape_cast %299 : vector<24xf32> to vector<24x1xf32>
    %301 = math.log %300 : vector<24x1xf32>
    %302 = arith.addf %301, %295 : vector<24x1xf32>
    %303 = vector.broadcast %302 : vector<24x1xf32> to vector<24x16xf32>
    %304 = arith.subf %293, %303 : vector<24x16xf32>
    %c0_86 = arith.constant 0 : index
    %c0_87 = arith.constant 0 : index
    %305 = vector.load %arg6[%c0_86, %c0_87] : memref<24x16xf32, #tpu.memory_space<vmem>>, vector<24x16xf32>
    tpu.vector_store %arg6[%c0_86, %c0_87], %304 {strides = array<i32>} : memref<24x16xf32, #tpu.memory_space<vmem>>, vector<24x16xf32>,
    return
  }
  func.func @transform_0(%arg0: i32) -> (i32, i32) {
    %c0_i32 = arith.constant 0 : i32
    %c0_i32_0 = arith.constant 0 : i32
    %c0_i32_1 = arith.constant 0 : i32
    return %c0_i32, %c0_i32_0 : i32, i32
  }
  func.func @transform_1(%arg0: i32) -> (i32, i32) {
    %c0_i32 = arith.constant 0 : i32
    %c0_i32_0 = arith.constant 0 : i32
    %c0_i32_1 = arith.constant 0 : i32
    return %c0_i32, %c0_i32_0 : i32, i32
  }
  func.func @transform_2(%arg0: i32) -> (i32, i32, i32) {
    %c0_i32 = arith.constant 0 : i32
    %c0_i32_0 = arith.constant 0 : i32
    %c0_i32_1 = arith.constant 0 : i32
    %c0_i32_2 = arith.constant 0 : i32
    return %c0_i32, %c0_i32_0, %c0_i32_1 : i32, i32, i32
  }
  func.func @transform_3(%arg0: i32) -> (i32, i32) {
    %c0_i32 = arith.constant 0 : i32
    %c0_i32_0 = arith.constant 0 : i32
    %c0_i32_1 = arith.constant 0 : i32
    return %c0_i32, %c0_i32_0 : i32, i32
  }
  func.func @transform_4(%arg0: i32) -> (i32, i32) {
    %c0_i32 = arith.constant 0 : i32
    %c0_i32_0 = arith.constant 0 : i32
    %c0_i32_1 = arith.constant 0 : i32
    return %c0_i32, %c0_i32_0 : i32, i32
  }
  func.func @transform_5(%arg0: i32) -> (i32, i32) {
    %c0_i32 = arith.constant 0 : i32
    %c0_i32_0 = arith.constant 0 : i32
    %c0_i32_1 = arith.constant 0 : i32
    return %c0_i32, %c0_i32_0 : i32, i32
  }
}

</mosaic_0001>

<bundles_post_ra>
// kernel: tpu_custom_call.1
= control target key start
LH: loop header
LB: loop body
LE: loop exit
PB: predicated region body
PF: predicated region fallthrough
CT: control target
= control target key end

     0   :  { %v5381_v0 = vmov 0.0|0.0   ;;  %vm5382_vm0 = vmmov 0   ;;  %v5383_v3 = vmov 0.0   ;;  %vm43_vm1 = vcmask 130048   ;;  %s5385_s13 = smov 96   ;;  %s5953_s3 = inlined_call_operand.vmem [shape: f32[50,128], index: 3, kind: input, shape index: {}]   ;;  %s5954_s0 = inlined_call_operand.vmem [shape: f32[24,16], index: 0, kind: input, shape index: {}]   ;;  %s5955_s1 = inlined_call_operand.vmem [shape: f32[4,32], index: 1, kind: input, shape index: {}]   ;;  %s5956_s2 = inlined_call_operand.vmem [shape: f32[4,8,32], index: 2, kind: input, shape index: {}]   ;;  %s5957_s4 = inlined_call_operand.vmem [shape: f32[65,16], index: 4, kind: input, shape index: {}]   ;;  %s5958_s5 = inlined_call_operand.vmem [shape: f32[24,16], index: 5, kind: output, shape index: {}]  }
   0x1   :  { %5225 = vmatprep.subr.bf16.mxu0 %v5381_v0  ;;  %v20_v1 = vld [vmem:[%s5953_s3] sm:$0xff]  ;;  %v21_v2 = vld [vmem:[%s5953_s3 + $0x8] sm:$0xff]  ;;  %5049 = vmatprep.mubr.msk.f32.mxu0 %vm5382_vm0, %v5383_v3  ;;  %v22_v5 = vld [vmem:[%s5953_s3 + $0x10] sm:$0xff]  ;;  %vm154_vm2 = vcmask 261120   ;;  %v39_v15 = vlaneseq  ;;  %vm229_vm3 = vcmask 257024   ;;  %vm3323_vm4 = vcmask 60416  }
   0x2   :  { %v5226_v4 = vpack.c.bf16 %v21_v2, %v20_v1  ;;  %v23_v6 = vld [vmem:[%s5953_s3 + $0x18] sm:$0xff]  ;;  %5240 = vmatprep.subr.bf16.mxu1 %v5381_v0  ;;  %5088 = vmatprep.mubr.msk.f32.mxu1 %vm5382_vm0, %v5383_v3  ;;  %v36_v8 = vld [vmem:[%s5954_s0] sm:$0xff]  ;;  %v25_v10 = vld [vmem:[%s5953_s3 + $0x28] sm:$0xff]  ;;  %vm4072_vm5 = vcmask 64512   ;;  %vm4787_vm6 = vcmask 523264  }
   0x3   :  { %v5437_v7 = vpack.c.bf16 %v23_v6, %v22_v5  ;;  %v24_v9 = vld [vmem:[%s5953_s3 + $0x20] sm:$0xff]  ;;  %v37_v12 = vld [vmem:[%s5954_s0 + $0x8] sm:$0xff]  ;;  %v38_v13 = vld [vmem:[%s5954_s0 + $0x10] sm:$0xff]  ;;  %v5484_v16 = vshrl.u32 %v39_v15, 7 }
   0x4   :  { %5227 = vmatpush3.bf16.msra.mxu0 %v5226_v4  ;;  %v5452_v11 = vpack.c.bf16 %v25_v10, %v24_v9  ;;  %v148_v14 = vld [vmem:[%s5955_s1] sm:$0xf]  ;;  %v26_v18 = vld [vmem:[%s5953_s3 + $0x30] sm:$0x3]  ;;  %s5384_s3 = smov 64  }
   0x5   :  { %5228 = vmatprep.subr.bf16.mxu0 %v5381_v0  ;;  %5242 = vmatpush3.bf16.msra.mxu1 %v5437_v7  ;;  %v41_v17 = vsub.s32 0, %v5484_v16  ;;  %v152_v25 = vsub.s32 1, %v5484_v16 }
   0x6   :  { %5243 = vmatprep.subr.bf16.mxu1 %v5381_v0 }
   0x7   :  { %5050 = vmatmul.mubr.msk.f32.vlgmr.msra.gmra.mrb[0].mxu0 %vm43_vm1, %v36_v8  ;;  %v42_v19 = vrot.slane %v26_v18, %v41_v17  ;;  %v5491_v30 = vrot.slane %v26_v18, %v152_v25 }
   0x8   :  { %5230 = vmatpush3.bf16.msra.mxu0 %v5437_v7  ;;  %5052 = vmatprep.mubr.msk.f32.mxu0 %vm5382_vm0, %v5383_v3 }
   0x9   :  { %5231 = vmatprep.subr.bf16.mxu0 %v5381_v0  ;;  %5245 = vmatpush3.bf16.msra.mxu1 %v5452_v11 }
   0xa   :  { %5252 = vmatprep.subr.bf16.mxu1 %v5381_v0 }
   0xb   :  { %5053 = vmatmul.mubr.msk.f32.gmra.mrb[2].mxu0 %vm43_vm1, %v37_v12 }
   0xc   :  { %5055 = vmatprep.mubr.msk.f32.mxu0 %vm5382_vm0, %v5383_v3  ;;  %5233 = vmatpush3.bf16.msra.mxu0 %v5452_v11 }
   0xd   :  { %5234 = vmatprep.subr.bf16.mxu0 %v5381_v0 }
   0xf   :  { %5056 = vmatmul.mubr.msk.f32.gmra.mrb[4].mxu0 %vm43_vm1, %v38_v13 }
  0x10   :  { %5066 = vmatprep.mubr.msk.f32.mxu0 %vm5382_vm0, %v5383_v3 }
  0x13   :  { %5067 = vmatmul.mubr.msk.f32.vlgmr.msra.gmra.mrb[6].mxu0 %vm154_vm2, %v148_v14 }
  0x14   :  { %5236 = vmatpush3.bf16.msra.mxu0 %v5437_v7  ;;  %5077 = vmatprep.mubr.msk.f32.mxu0 %vm5382_vm0, %v5383_v3 }
  0x15   :  { %5237 = vmatprep.subr.bf16.mxu0 %v5381_v0 }
  0x18   :  { %5239 = vmatpush3.bf16.msra.mxu0 %v5452_v11 }
  0x19   :  { %5246 = vmatprep.subr.bf16.mxu0 %v5381_v0 }
  0xda   :  { %v119_v20 = vpop.f32.mrb[0].mxu0 }
  0xdb   :  { %v120_v21 = vadd.f32 %v119_v20, %v42_v19  ;;  %v5051_v22 = vpop.f32.mrb[1].mxu0 }
  0xdd   :  { %v136_v23 = vcombine.high %v120_v21, %v120_v21  ;;  %142 = vst [vmem:[#allocation2] sm:$0xf] %v120_v21 }
  0xde   :  { %v124_v24 = vpop.f32.mrb[2].mxu0 }
  0xdf   :  { %143 = vst [vmem:[#allocation2 + $0x4] sm:$0xf] %v136_v23  ;;  %v125_v26 = vadd.f32 %v124_v24, %v42_v19  ;;  %v5054_v27 = vpop.f32.mrb[3].mxu0 }
  0xe1   :  { %v137_v28 = vcombine.high %v125_v26, %v125_v26  ;;  %144 = vst [vmem:[#allocation2 + $0x8] sm:$0xf] %v125_v26 }
  0xe2   :  { %v129_v29 = vpop.f32.mrb[4].mxu0 }
  0xe3   :  { %145 = vst [vmem:[#allocation2 + $0xc] sm:$0xf] %v137_v28  ;;  %v130_v31 = vadd.f32 %v129_v29, %v42_v19  ;;  %v5057_v32 = vpop.f32.mrb[5].mxu0 }
  0xe4   :  { %v149_v37 = vld [vmem:[#allocation2] sm:$0xf] }
  0xe5   :  { %v138_v33 = vcombine.high %v130_v31, %v130_v31  ;;  %146 = vst [vmem:[#allocation2 + $0x10] sm:$0xf] %v130_v31 }
  0xe6   :  { %v224_v34 = vpop.f32.mrb[6].mxu0  ;;  %v265_v58 = vld [vmem:[#allocation2 + $0x4] sm:$0xf] }
  0xe7   :  { %147 = vst [vmem:[#allocation2 + $0x14] sm:$0xf] %v138_v33  ;;  %v225_v35 = vadd.f32 %v224_v34, %v5491_v30  ;;  %v5068_v36 = vpop.f32.mrb[7].mxu0 }
  0xe8   :  { %v373_v19 = vld [vmem:[#allocation2 + $0x8] sm:$0xf] }
  0xe9   :  { %v228_v38 = vadd.f32 %v225_v35, %v149_v37  ;;  %238 = vrot.lane.b32.xlu0 %v225_v35, %s5384_s3 }
  0xeb   :  { %230 = vst.msk [vmem:[#allocation3] sm:$0xf] %vm229_vm3, %v228_v38  ;;  %v4924_v39 = vmul.f32 -1.442695, %v228_v38 }
  0xed   :  { %5308 = vpow2.f32 %v4924_v39 }
  0xf7   :  { %v5309_v40 = vpop.eup %5308 }
  0xf8   :  { %v234_v41 = vadd.f32 1.0, %v5309_v40  ;;  %v481_v40 = vld [vmem:[#allocation2 + $0xc] sm:$0xf] }
  0xfa   :  { %5310 = vrcp.f32 %v234_v41 }
 0x104   :  { %v5311_v42 = vpop.eup %5310 }
 0x105   :  { %v248_v49 = vsub.f32 1.0, %v5311_v42 }
 0x15b   :  { %v239_v43 = vpop.permute.xlu0 %238 }
 0x15c   :  { %v241_v44 = vmul.f32 %v5311_v42, %v239_v43 }
 0x15e   :  { %243 = vrot.lane.b32.xlu0 %v241_v44, %s5384_s3 }
 0x1d0   :  { %v244_v45 = vpop.permute.xlu0 %243 }
 0x1d1   :  { %v246_v46 = vadd.f32 %v244_v45, %v149_v37 }
 0x1d3   :  { %5312 = vtanh.f32 %v246_v46 }
 0x1dd   :  { %v5313_v47 = vpop.eup %5312 }
 0x1de   :  { %250 = vrot.lane.b32.xlu1 %v5313_v47, %s5385_s13 }
 0x1e2   :  { %254 = vrot.lane.b32.xlu1 %v148_v14, %s5384_s3 }
 0x250   :  { %v251_v48 = vpop.permute.xlu1 %250 }
 0x251   :  { %v253_v51 = vmul.f32 %v251_v48, %v248_v49 }
 0x254   :  { %v255_v50 = vpop.permute.xlu1 %254 }
 0x255   :  { %v257_v52 = vmul.f32 %v5311_v42, %v255_v50 }
 0x257   :  { %v258_v53 = vadd.f32 %v257_v52, %v253_v51 }
 0x259   :  { %260 = vrot.lane.b32.xlu0 %v258_v53, %s5384_s3 }
 0x2cb   :  { %v261_v54 = vpop.permute.xlu0 %260 }
 0x2cc   :  { %263 = vst.msk [vmem:[#allocation4] sm:$0xf] %vm229_vm3, %v261_v54  ;;  %5078 = vmatmul.mubr.msk.f32.vlgmr.msra.gmra.mrb[8].mxu0 %vm154_vm2, %v261_v54 }
 0x2cd   :  { %5248 = vmatpush3.bf16.msra.mxu0 %v5437_v7  ;;  %5099 = vmatprep.mubr.msk.f32.mxu0 %vm5382_vm0, %v5383_v3 }
 0x2ce   :  { %5249 = vmatprep.subr.bf16.mxu0 %v5381_v0 }
 0x2d1   :  { %5251 = vmatpush3.bf16.msra.mxu0 %v5452_v11 }
 0x2d2   :  { %5258 = vmatprep.subr.bf16.mxu0 %v5381_v0 }
 0x39f   :  { %v334_v55 = vpop.f32.mrb[8].mxu0 }
 0x3a0   :  { %v335_v56 = vadd.f32 %v334_v55, %v5491_v30  ;;  %v5079_v57 = vpop.f32.mrb[9].mxu0 }
 0x3a2   :  { %v338_v59 = vadd.f32 %v335_v56, %v265_v58  ;;  %348 = vrot.lane.b32.xlu1 %v335_v56, %s5384_s3 }
 0x3a4   :  { %340 = vst.msk [vmem:[#allocation3 + $0x4] sm:$0xf] %vm229_vm3, %v338_v59  ;;  %v4926_v60 = vmul.f32 -1.442695, %v338_v59 }
 0x3a6   :  { %5314 = vpow2.f32 %v4926_v60 }
 0x3b0   :  { %v5315_v61 = vpop.eup %5314 }
 0x3b1   :  { %v344_v62 = vadd.f32 1.0, %v5315_v61 }
 0x3b3   :  { %5316 = vrcp.f32 %v344_v62 }
 0x3bd   :  { %v5317_v63 = vpop.eup %5316 }
 0x3be   :  { %v358_v8 = vsub.f32 1.0, %v5317_v63  ;;  %v364_v10 = vmul.f32 %v5317_v63, %v258_v53 }
 0x414   :  { %v349_v1 = vpop.permute.xlu1 %348 }
 0x415   :  { %v351_v2 = vmul.f32 %v5317_v63, %v349_v1 }
 0x417   :  { %353 = vrot.lane.b32.xlu0 %v351_v2, %s5384_s3 }
 0x489   :  { %v354_v4 = vpop.permute.xlu0 %353 }
 0x48a   :  { %v356_v5 = vadd.f32 %v354_v4, %v265_v58  ;;  %v589_v58 = vld [vmem:[#allocation2 + $0x10] sm:$0xf] }
 0x48c   :  { %5318 = vtanh.f32 %v356_v5 }
 0x496   :  { %v5319_v6 = vpop.eup %5318 }
 0x497   :  { %360 = vrot.lane.b32.xlu1 %v5319_v6, %s5385_s13 }
 0x509   :  { %v361_v9 = vpop.permute.xlu1 %360 }
 0x50a   :  { %v363_v12 = vmul.f32 %v361_v9, %v358_v8  ;;  %v808_v8 = vld [vmem:[#allocation3] sm:$0xf] }
 0x50c   :  { %v365_v13 = vadd.f32 %v364_v10, %v363_v12 }
 0x50e   :  { %367 = vrot.lane.b32.xlu0 %v365_v13, %s5384_s3 }
 0x580   :  { %v368_v14 = vpop.permute.xlu0 %367 }
 0x581   :  { %371 = vst.msk [vmem:[#allocation4 + $0x4] sm:$0xf] %vm229_vm3, %v368_v14  ;;  %5089 = vmatmul.mubr.msk.f32.vlgmr.msra.gmra.mrb[0].mxu1 %vm154_vm2, %v368_v14 }
 0x582   :  { %5254 = vmatpush3.bf16.msra.mxu1 %v5437_v7  ;;  %5110 = vmatprep.mubr.msk.f32.mxu1 %vm5382_vm0, %v5383_v3 }
 0x583   :  { %5255 = vmatprep.subr.bf16.mxu1 %v5381_v0 }
 0x586   :  { %5257 = vmatpush3.bf16.msra.mxu1 %v5452_v11 }
 0x587   :  { %5264 = vmatprep.subr.bf16.mxu1 %v5381_v0 }
 0x654   :  { %v442_v15 = vpop.f32.mrb[0].mxu1 }
 0x655   :  { %v443_v17 = vadd.f32 %v442_v15, %v5491_v30  ;;  %v5090_v18 = vpop.f32.mrb[1].mxu1 }
 0x657   :  { %v446_v20 = vadd.f32 %v443_v17, %v373_v19  ;;  %456 = vrot.lane.b32.xlu1 %v443_v17, %s5384_s3  ;;  %v809_v17 = vld [vmem:[#allocation3 + $0x4] sm:$0xf] }
 0x659   :  { %448 = vst.msk [vmem:[#allocation3 + $0x8] sm:$0xf] %vm229_vm3, %v446_v20  ;;  %v4928_v21 = vmul.f32 -1.442695, %v446_v20 }
 0x65b   :  { %5320 = vpow2.f32 %v4928_v21 }
 0x660   :  { %v810_v18 = vld [vmem:[#allocation3 + $0x8] sm:$0xf] }
 0x665   :  { %v5321_v22 = vpop.eup %5320 }
 0x666   :  { %v452_v23 = vadd.f32 1.0, %v5321_v22 }
 0x668   :  { %5322 = vrcp.f32 %v452_v23 }
 0x672   :  { %v5323_v24 = vpop.eup %5322 }
 0x673   :  { %v466_v31 = vsub.f32 1.0, %v5323_v24  ;;  %v472_v33 = vmul.f32 %v5323_v24, %v365_v13 }
 0x6c9   :  { %v457_v25 = vpop.permute.xlu1 %456 }
 0x6ca   :  { %v459_v26 = vmul.f32 %v5323_v24, %v457_v25 }
 0x6cc   :  { %461 = vrot.lane.b32.xlu0 %v459_v26, %s5384_s3 }
 0x73e   :  { %v462_v27 = vpop.permute.xlu0 %461 }
 0x73f   :  { %v464_v28 = vadd.f32 %v462_v27, %v373_v19 }
 0x741   :  { %5324 = vtanh.f32 %v464_v28 }
 0x74b   :  { %v5325_v29 = vpop.eup %5324 }
 0x74c   :  { %468 = vrot.lane.b32.xlu1 %v5325_v29, %s5385_s13 }
 0x7be   :  { %v469_v32 = vpop.permute.xlu1 %468 }
 0x7bf   :  { %v471_v34 = vmul.f32 %v469_v32, %v466_v31 }
 0x7c1   :  { %v473_v35 = vadd.f32 %v472_v33, %v471_v34 }
 0x7c3   :  { %475 = vrot.lane.b32.xlu0 %v473_v35, %s5384_s3 }
 0x835   :  { %v476_v36 = vpop.permute.xlu0 %475 }
 0x836   :  { %479 = vst.msk [vmem:[#allocation4 + $0x8] sm:$0xf] %vm229_vm3, %v476_v36  ;;  %5100 = vmatmul.mubr.msk.f32.vlgmr.msra.gmra.mrb[10].mxu0 %vm154_vm2, %v476_v36  ;;  %v5386_v36 = vmov 1983009808  }
 0x837   :  { %5260 = vmatpush3.bf16.msra.mxu0 %v5437_v7  ;;  %5121 = vmatprep.mubr.msk.f32.mxu0 %vm5382_vm0, %v5383_v3 }
 0x838   :  { %5261 = vmatprep.subr.bf16.mxu0 %v5381_v0 }
 0x83b   :  { %5263 = vmatpush3.bf16.msra.mxu0 %v5452_v11 }
 0x83c   :  { %5270 = vmatprep.subr.bf16.mxu0 %v5381_v0 }
 0x909   :  { %v550_v37 = vpop.f32.mrb[10].mxu0 }
 0x90a   :  { %v551_v38 = vadd.f32 %v550_v37, %v5491_v30  ;;  %v5101_v39 = vpop.f32.mrb[11].mxu0  ;;  %v1015_v37 = vunpack.c.l.s4 %v5386_v36 }
 0x90c   :  { %v554_v41 = vadd.f32 %v551_v38, %v481_v40  ;;  %564 = vrot.lane.b32.xlu1 %v551_v38, %s5384_s3 }
 0x90e   :  { %556 = vst.msk [vmem:[#allocation3 + $0xc] sm:$0xf] %vm229_vm3, %v554_v41  ;;  %v4930_v7 = vmul.f32 -1.442695, %v554_v41 }
 0x910   :  { %5326 = vpow2.f32 %v4930_v7 }
 0x915   :  { %v811_v9 = vld [vmem:[#allocation3 + $0xc] sm:$0xf] }
 0x91a   :  { %v5327_v42 = vpop.eup %5326 }
 0x91b   :  { %v560_v43 = vadd.f32 1.0, %v5327_v42 }
 0x91d   :  { %5328 = vrcp.f32 %v560_v43 }
 0x927   :  { %v5329_v44 = vpop.eup %5328 }
 0x928   :  { %v574_v49 = vsub.f32 1.0, %v5329_v44  ;;  %v580_v51 = vmul.f32 %v5329_v44, %v473_v35 }
 0x97e   :  { %v565_v45 = vpop.permute.xlu1 %564 }
 0x97f   :  { %v567_v11 = vmul.f32 %v5329_v44, %v565_v45 }
 0x981   :  { %569 = vrot.lane.b32.xlu0 %v567_v11, %s5384_s3 }
 0x9f3   :  { %v570_v46 = vpop.permute.xlu0 %569 }
 0x9f4   :  { %v572_v47 = vadd.f32 %v570_v46, %v481_v40  ;;  %v1016_v40 = vunpack.c.0.s8 %v1015_v37 }
 0x9f6   :  { %5330 = vtanh.f32 %v572_v47  ;;  %v5588_v42 = vsub.s32 %v1016_v40, %v5484_v16  ;;  %v697_v47 = vld [vmem:[#allocation2 + $0x14] sm:$0xf] }
 0xa00   :  { %v5331_v48 = vpop.eup %5330 }
 0xa01   :  { %576 = vrot.lane.b32.xlu1 %v5331_v48, %s5385_s13 }
 0xa73   :  { %v577_v50 = vpop.permute.xlu1 %576 }
 0xa74   :  { %v579_v52 = vmul.f32 %v577_v50, %v574_v49 }
 0xa76   :  { %v581_v53 = vadd.f32 %v580_v51, %v579_v52  ;;  %v5387_v52 = vmov 1934713408  }
 0xa78   :  { %583 = vrot.lane.b32.xlu0 %v581_v53, %s5384_s3 }
 0xaea   :  { %v584_v54 = vpop.permute.xlu0 %583 }
 0xaeb   :  { %587 = vst.msk [vmem:[#allocation4 + $0xc] sm:$0xf] %vm229_vm3, %v584_v54  ;;  %5111 = vmatmul.mubr.msk.f32.vlgmr.msra.gmra.mrb[2].mxu1 %vm154_vm2, %v584_v54 }
 0xaec   :  { %5132 = vmatprep.mubr.msk.f32.mxu1 %vm5382_vm0, %v5383_v3 }
 0xbbe   :  { %v658_v55 = vpop.f32.mrb[2].mxu1 }
 0xbbf   :  { %v659_v56 = vadd.f32 %v658_v55, %v5491_v30  ;;  %v5112_v57 = vpop.f32.mrb[3].mxu1 }
 0xbc1   :  { %v662_v59 = vadd.f32 %v659_v56, %v589_v58  ;;  %672 = vrot.lane.b32.xlu1 %v659_v56, %s5384_s3 }
 0xbc3   :  { %664 = vst.msk [vmem:[#allocation3 + $0x10] sm:$0xf] %vm229_vm3, %v662_v59  ;;  %v4932_v60 = vmul.f32 -1.442695, %v662_v59 }
 0xbc5   :  { %5332 = vpow2.f32 %v4932_v60 }
 0xbca   :  { %v812_v19 = vld [vmem:[#allocation3 + $0x10] sm:$0xf] }
 0xbcf   :  { %v5333_v61 = vpop.eup %5332 }
 0xbd0   :  { %v668_v62 = vadd.f32 1.0, %v5333_v61 }
 0xbd2   :  { %5334 = vrcp.f32 %v668_v62 }
 0xbdc   :  { %v5335_v63 = vpop.eup %5334 }
 0xbdd   :  { %v682_v10 = vsub.f32 1.0, %v5335_v63  ;;  %v688_v13 = vmul.f32 %v5335_v63, %v581_v53  ;;  %v1077_v53 = vunpack.c.l.s4 %v5387_v52 }
 0xbdf   :  { %v1078_v56 = vunpack.c.0.s8 %v1077_v53 }
 0xc33   :  { %v673_v1 = vpop.permute.xlu1 %672 }
 0xc34   :  { %v675_v2 = vmul.f32 %v5335_v63, %v673_v1  ;;  %v5613_v63 = vsub.s32 %v1078_v56, %v5484_v16 }
 0xc36   :  { %677 = vrot.lane.b32.xlu0 %v675_v2, %s5384_s3 }
 0xca8   :  { %v678_v4 = vpop.permute.xlu0 %677 }
 0xca9   :  { %v680_v5 = vadd.f32 %v678_v4, %v589_v58 }
 0xcab   :  { %5336 = vtanh.f32 %v680_v5 }
 0xcb5   :  { %v5337_v6 = vpop.eup %5336 }
 0xcb6   :  { %684 = vrot.lane.b32.xlu1 %v5337_v6, %s5385_s13 }
 0xcdf   :  { %820 = vxpose.xlu1.b32.start.end [1/1] (short) (narrow) %v808_v8, 32 }
 0xcec   :  { %916 = vxpose.xlu1.b32.start.end [1/1] (short) (narrow) %v811_v9, 32 }
 0xd28   :  { %v685_v12 = vpop.permute.xlu1 %684 }
 0xd29   :  { %v687_v14 = vmul.f32 %v685_v12, %v682_v10 }
 0xd2b   :  { %v5551_v15 = vadd.f32 %v688_v13, %v687_v14 }
 0xd2d   :  { %691 = vrot.lane.b32.xlu0 %v5551_v15, %s5384_s3 }
 0xd4b   :  { %852 = vxpose.xlu0.b32.start.end [1/1] (short) (narrow) %v809_v17, 32 }
 0xd58   :  { %884 = vxpose.xlu0.b32.start.end [1/1] (short) (narrow) %v810_v18, 32 }
 0xd5f   :  { %v836_v22 = vpop.trf.xlu1 }
 0xd63   :  { %v5561_v24 = vpop.trf.xlu1 }
 0xd65   :  { %948 = vxpose.xlu0.b32.start.end [1/1] (short) (narrow) %v812_v19, 32 }
 0xd67   :  { %v5565_v26 = vpop.trf.xlu1 }
 0xd6b   :  { %v5569_v28 = vpop.trf.xlu1 }
 0xd6f   :  { %v932_v31 = vpop.trf.xlu1 }
 0xd73   :  { %v5573_v33 = vpop.trf.xlu1 }
 0xd77   :  { %v5577_v35 = vpop.trf.xlu1 }
 0xd7b   :  { %v5581_v39 = vpop.trf.xlu1 }
 0xd9f   :  { %v692_v20 = vpop.permute.xlu0 %691 }
 0xda0   :  { %695 = vst.msk [vmem:[#allocation4 + $0x10] sm:$0xf] %vm229_vm3, %v692_v20  ;;  %5122 = vmatmul.mubr.msk.f32.vlgmr.msra.gmra.mrb[12].mxu0 %vm154_vm2, %v692_v20 }
 0xda1   :  { %5143 = vmatprep.mubr.msk.f32.mxu0 %vm5382_vm0, %v5383_v3 }
 0xdcb   :  { %v868_v21 = vpop.trf.xlu0 }
 0xdcc   :  { %v1028_v54 = vcombine.low %v868_v21, %v932_v31  ;;  %v1029_v59 = vcombine.high %v868_v21, %v932_v31 }
 0xdce   :  { %v1036_v60 = vrot.slane %v1028_v54, %v5588_v42  ;;  %v1043_v4 = vrot.slane %v1029_v59, %v5588_v42 }
 0xdcf   :  { %v5559_v23 = vpop.trf.xlu0 }
 0xdd0   :  { %v1162_v18 = vcombine.low %v5559_v23, %v5573_v33 }
 0xdd3   :  { %v5563_v25 = vpop.trf.xlu0 }
 0xdd7   :  { %v5567_v27 = vpop.trf.xlu0 }
 0xdd8   :  { %v1431_v7 = vcombine.high %v5567_v27, %v5581_v39 }
 0xdda   :  { %v5594_v44 = vrot.slane %v1431_v7, %v5588_v42 }
 0xddb   :  { %v900_v29 = vpop.trf.xlu0 }
 0xddc   :  { %v1013_v57 = vcombine.high %v836_v22, %v900_v29 }
 0xdde   :  { %v1027_v1 = vrot.slane %v1013_v57, %v5588_v42 }
 0xddf   :  { %v5571_v32 = vpop.trf.xlu0 }
 0xde0   :  { %v1146_v13 = vcombine.low %v5561_v24, %v5571_v32  ;;  %v1090_v21 = vcombine.low %v1027_v1, %v1043_v4  ;;  %v1091_v52 = vcombine.high %v1027_v1, %v1043_v4  ;;  %v1147_v59 = vcombine.high %v5561_v24, %v5571_v32 }
 0xde3   :  { %v5575_v34 = vpop.trf.xlu0 }
 0xde7   :  { %v5579_v38 = vpop.trf.xlu0 }
 0xde8   :  { %v1415_v41 = vcombine.high %v5569_v28, %v5579_v38 }
 0xdea   :  { %v5591_v43 = vrot.slane %v1415_v41, %v5588_v42 }
 0xdeb   :  { %v964_v55 = vpop.trf.xlu0 }
 0xdec   :  { %v1492_v49 = vcombine.low %v5591_v43, %v5594_v44  ;;  %v1493_v50 = vcombine.high %v5591_v43, %v5594_v44  ;;  %v1044_v61 = vcombine.high %v964_v55, %v5383_v3  ;;  %v1051_v62 = vrot.slane %v964_v55, %v5588_v42 }
 0xdee   :  { %v1058_v9 = vrot.slane %v1044_v61, %v5588_v42  ;;  %v1105_v61 = vrot.slane %v1091_v52, %v5613_v63 }
 0xdef   :  { %v965_v14 = vpop.trf.xlu0 }
 0xdf0   :  { %v1185_v31 = vrot.slane %v965_v14, %v5588_v42  ;;  %v1178_v53 = vcombine.high %v965_v14, %v5383_v3 }
 0xdf2   :  { %v1192_v1 = vrot.slane %v1178_v53, %v5588_v42 }
 0xe73   :  { %v766_v45 = vpop.f32.mrb[12].mxu0 }
 0xe74   :  { %v5597_v11 = vadd.f32 %v766_v45, %v5491_v30  ;;  %v5123_v46 = vpop.f32.mrb[13].mxu0  ;;  %v1012_v30 = vcombine.low %v836_v22, %v900_v29 }
 0xe75   :  { %v1154_v46 = vrot.slane %v1146_v13, %v5588_v42 }
 0xe76   :  { %v5600_v48 = vadd.f32 %v5597_v11, %v697_v47  ;;  %v1020_v58 = vrot.slane %v1012_v30, %v5588_v42  ;;  %v1170_v47 = vrot.slane %v1162_v18, %v5588_v42  ;;  %v1296_v18 = vcombine.low %v5563_v25, %v5577_v35 }
 0xe78   :  { %772 = vst.msk [vmem:[#allocation3 + $0x14] sm:$0xf] %vm229_vm3, %v5600_v48  ;;  %v1074_v8 = vcombine.low %v1020_v58, %v1036_v60  ;;  %v1075_v22 = vcombine.high %v1020_v58, %v1036_v60  ;;  %v1163_v60 = vcombine.high %v5559_v23, %v5573_v33  ;;  %v1209_v32 = vcombine.high %v1154_v46, %v1170_v47  ;;  %v966_v33 = vpop.trf.xlu0 }
 0xe7a   :  { %v1082_v19 = vrot.slane %v1074_v8, %v5613_v63  ;;  %v1089_v30 = vrot.slane %v1075_v22, %v5613_v63  ;;  %v1177_v24 = vrot.slane %v1163_v60, %v5588_v42 }
 0xe7f   :  { %v813_v51 = vld [vmem:[#allocation3 + $0x14] sm:$0xf] }
 0xe80   :  { %980 = vxpose.xlu1.b32.start.end [1/1] (short) (narrow) %v813_v51, 32  ;;  %v1098_v51 = vrot.slane %v1090_v21, %v5613_v63  ;;  %v1319_v21 = vrot.slane %v966_v33, %v5588_v42 }
 0xf00   :  { %v996_v2 = vpop.trf.xlu1 }
 0xf01   :  { %v1059_v5 = vcombine.high %v996_v2, %v5383_v3  ;;  %v1066_v6 = vrot.slane %v996_v2, %v5588_v42 }
 0xf03   :  { %v1073_v10 = vrot.slane %v1059_v5, %v5588_v42  ;;  %v1106_v12 = vcombine.low %v1051_v62, %v1066_v6  ;;  %v1107_v16 = vcombine.high %v1051_v62, %v1066_v6  ;;  %v1208_v62 = vcombine.low %v1154_v46, %v1170_v47 }
 0xf04   :  { %v997_v17 = vpop.trf.xlu1  ;;  %v1312_v46 = vcombine.high %v966_v33, %v5383_v3 }
 0xf05   :  { %v1114_v20 = vrot.slane %v1106_v12, %v5613_v63  ;;  %v1122_v29 = vcombine.low %v1058_v9, %v1073_v10  ;;  %v1200_v36 = vrot.slane %v997_v17, %v5588_v42  ;;  %v1123_v40 = vcombine.high %v1058_v9, %v1073_v10 }
 0xf06   :  { %v1121_v7 = vrot.slane %v1107_v16, %v5613_v63  ;;  %v1193_v54 = vcombine.high %v997_v17, %v5383_v3  ;;  %v1161_v9 = vrot.slane %v1147_v59, %v5588_v42  ;;  %v1216_v23 = vrot.slane %v1208_v62, %v5613_v63 }
 0xf07   :  { %v1139_v37 = vcombine.high %v1082_v19, %v1114_v20  ;;  %v1138_v41 = vcombine.low %v1082_v19, %v1114_v20  ;;  %v1130_v45 = vrot.slane %v1122_v29, %v5613_v63  ;;  %v1240_v55 = vcombine.low %v1185_v31, %v1200_v36 }
 0xf08   :  { %v1137_v57 = vrot.slane %v1123_v40, %v5613_v63  ;;  %v1140_v58 = vcombine.low %v1089_v30, %v1121_v7  ;;  %v1207_v2 = vrot.slane %v1193_v54, %v5588_v42  ;;  %v1241_v4 = vcombine.high %v1185_v31, %v1200_v36  ;;  %v998_v16 = vpop.trf.xlu1 }
 0xf09   :  { %1580 = vxpose.xlu1.b32.start.end [1/1] (short) (narrow) %v1139_v37, 8  ;;  %1548 = vxpose.xlu0.b32.start.end [1/1] (short) (narrow) %v1138_v41, 8  ;;  %v1142_v56 = vcombine.low %v1098_v51, %v1130_v45  ;;  %v1248_v6 = vrot.slane %v1240_v55, %v5613_v63  ;;  %v1141_v8 = vcombine.high %v1089_v30, %v1121_v7 }
 0xf0a   :  { %v1144_v5 = vcombine.low %v1105_v61, %v1137_v57  ;;  %v1255_v12 = vrot.slane %v1241_v4, %v5613_v63  ;;  %v1256_v13 = vcombine.low %v1192_v1, %v1207_v2  ;;  %v1143_v14 = vcombine.high %v1098_v51, %v1130_v45 }
 0xf0b   :  { %v1272_v10 = vcombine.low %v1216_v23, %v1248_v6  ;;  %v1280_v17 = vcombine.low %v5565_v26, %v5575_v34  ;;  %v1223_v19 = vrot.slane %v1209_v32, %v5613_v63  ;;  %v1224_v20 = vcombine.low %v1161_v9, %v1177_v24 }
 0xf0c   :  { %v1334_v22 = vrot.slane %v998_v16, %v5588_v42  ;;  %v1264_v31 = vrot.slane %v1256_v13, %v5613_v63  ;;  %v1257_v36 = vcombine.high %v1192_v1, %v1207_v2  ;;  %v1145_v37 = vcombine.high %v1105_v61, %v1137_v57 }
 0xf0d   :  { %1676 = vxpose.xlu1.b32.start.end [1/1] (short) (narrow) %v1142_v56, 8  ;;  %1612 = vxpose.xlu0.b32.start.end [1/1] (short) (narrow) %v1140_v58, 8  ;;  %v1274_v29 = vcombine.low %v1223_v19, %v1255_v12  ;;  %v1288_v40 = vrot.slane %v1280_v17, %v5588_v42  ;;  %v1304_v41 = vrot.slane %v1296_v18, %v5588_v42 }
 0xf0e   :  { %v1232_v7 = vrot.slane %v1224_v20, %v5613_v63  ;;  %v1225_v45 = vcombine.high %v1161_v9, %v1177_v24  ;;  %v1327_v47 = vcombine.high %v998_v16, %v5383_v3  ;;  %v1374_v51 = vcombine.low %v1319_v21, %v1334_v22 }
 0xf0f   :  { %v1271_v53 = vrot.slane %v1257_v36, %v5613_v63  ;;  %v1273_v30 = vcombine.high %v1216_v23, %v1248_v6  ;;  %v1281_v54 = vcombine.high %v5565_v26, %v5575_v34  ;;  %v1297_v55 = vcombine.high %v5563_v25, %v5577_v35  ;;  %v967_v35 = vpop.trf.xlu0 }
 0xf10   :  { %v1276_v52 = vcombine.low %v1232_v7, %v1264_v31  ;;  %v1239_v56 = vrot.slane %v1225_v45, %v5613_v63  ;;  %v1342_v57 = vcombine.low %v1288_v40, %v1304_v41  ;;  %v1326_v58 = vrot.slane %v1312_v46, %v5588_v42 }
 0xf11   :  { %1740 = vxpose.xlu1.b32.start.end [1/1] (short) (narrow) %v1144_v5, 8  ;;  %1644 = vxpose.xlu0.b32.start.end [1/1] (short) (narrow) %v1141_v8, 8  ;;  %v1341_v59 = vrot.slane %v1327_v47, %v5588_v42  ;;  %v1375_v60 = vcombine.high %v1319_v21, %v1334_v22  ;;  %v1382_v62 = vrot.slane %v1374_v51, %v5613_v63  ;;  %v999_v8 = vpop.trf.xlu1 }
 0xf12   :  { %v1278_v61 = vcombine.low %v1239_v56, %v1271_v53  ;;  %v1275_v1 = vcombine.high %v1223_v19, %v1255_v12  ;;  %v1295_v2 = vrot.slane %v1281_v54, %v5588_v42  ;;  %v1311_v26 = vrot.slane %v1297_v55, %v5588_v42 }
 0xf13   :  { %v1350_v25 = vrot.slane %v1342_v57, %v5613_v63  ;;  %v1343_v34 = vcombine.high %v1288_v40, %v1304_v41  ;;  %v1389_v5 = vrot.slane %v1375_v60, %v5613_v63  ;;  %v1390_v6 = vcombine.low %v1326_v58, %v1341_v59 }
 0xf14   :  { %v1277_v9 = vcombine.high %v1232_v7, %v1264_v31  ;;  %v1414_v24 = vcombine.low %v5569_v28, %v5579_v38  ;;  %v1430_v23 = vcombine.low %v5567_v27, %v5581_v39  ;;  %v1358_v33 = vcombine.low %v1295_v2, %v1311_v26 }
 0xf15   :  { %1804 = vxpose.xlu1.b32.start.end [1/1] (short) (narrow) %v1272_v10, 8  ;;  %1708 = vxpose.xlu0.b32.start.end [1/1] (short) (narrow) %v1143_v14, 8  ;;  %v1406_v4 = vcombine.low %v1350_v25, %v1382_v62  ;;  %v1357_v32 = vrot.slane %v1343_v34, %v5613_v63  ;;  %v1453_v10 = vrot.slane %v967_v35, %v5588_v42 }
 0xf16   :  { %v1468_v12 = vrot.slane %v999_v8, %v5588_v42  ;;  %v1398_v16 = vrot.slane %v1390_v6, %v5613_v63  ;;  %v1391_v14 = vcombine.high %v1326_v58, %v1341_v59  ;;  %v1279_v17 = vcombine.high %v1239_v56, %v1271_v53 }
 0xf17   :  { %v1408_v13 = vcombine.low %v1357_v32, %v1389_v5  ;;  %v1422_v18 = vrot.slane %v1414_v24, %v5588_v42  ;;  %v1438_v28 = vrot.slane %v1430_v23, %v5588_v42  ;;  %v1366_v27 = vrot.slane %v1358_v33, %v5613_v63 }
 0xf18   :  { %v1359_v38 = vcombine.high %v1295_v2, %v1311_v26  ;;  %v1446_v39 = vcombine.high %v967_v35, %v5383_v3  ;;  %v1461_v19 = vcombine.high %v999_v8, %v5383_v3  ;;  %v1508_v20 = vcombine.low %v1453_v10, %v1468_v12 }
 0xf19   :  { %1868 = vxpose.xlu1.b32.start.end [1/1] (short) (narrow) %v1274_v29, 8  ;;  %1772 = vxpose.xlu0.b32.start.end [1/1] (short) (narrow) %v1145_v37, 8  ;;  %v1410_v21 = vcombine.low %v1366_v27, %v1398_v16  ;;  %v1405_v22 = vrot.slane %v1391_v14, %v5613_v63  ;;  %v1407_v29 = vcombine.high %v1350_v25, %v1382_v62 }
 0xf1a   :  { %v1373_v31 = vrot.slane %v1359_v38, %v5613_v63  ;;  %v1476_v36 = vcombine.low %v1422_v18, %v1438_v28  ;;  %v1460_v37 = vrot.slane %v1446_v39, %v5588_v42  ;;  %v1475_v40 = vrot.slane %v1461_v19, %v5588_v42 }
 0xf1b   :  { %v1509_v41 = vcombine.high %v1453_v10, %v1468_v12  ;;  %v1516_v45 = vrot.slane %v1508_v20, %v5613_v63  ;;  %v1409_v46 = vcombine.high %v1357_v32, %v1389_v5  ;;  %v1477_v51 = vcombine.high %v1422_v18, %v1438_v28 }
 0xf1c   :  { %v1412_v7 = vcombine.low %v1373_v31, %v1405_v22  ;;  %v1484_v47 = vrot.slane %v1476_v36, %v5613_v63  ;;  %v1411_v54 = vcombine.high %v1366_v27, %v1398_v16  ;;  %v1525_v58 = vcombine.high %v1460_v37, %v1475_v40 }
 0xf1d   :  { %1932 = vxpose.xlu1.b32.start.end [1/1] (short) (narrow) %v1276_v52, 8  ;;  %1836 = vxpose.xlu0.b32.start.end [1/1] (short) (narrow) %v1273_v30, 8  ;;  %v1523_v53 = vrot.slane %v1509_v41, %v5613_v63  ;;  %v1524_v30 = vcombine.low %v1460_v37, %v1475_v40  ;;  %v1491_v55 = vrot.slane %v1477_v51, %v5613_v63 }
 0xf1e   :  { %v1540_v52 = vcombine.low %v1484_v47, %v1516_v45  ;;  %v1413_v59 = vcombine.high %v1373_v31, %v1405_v22  ;;  %v1500_v60 = vrot.slane %v1492_v49, %v5613_v63  ;;  %v1539_v62 = vrot.slane %v1525_v58, %v5613_v63 }
 0xf1f   :  { %v1542_v56 = vcombine.low %v1491_v55, %v1523_v53  ;;  %v1532_v57 = vrot.slane %v1524_v30, %v5613_v63  ;;  %v1507_v2 = vrot.slane %v1493_v50, %v5613_v63  ;;  %v1543_v25 = vcombine.high %v1491_v55, %v1523_v53 }
 0xf21   :  { %1996 = vxpose.xlu1.b32.start.end [1/1] (short) (narrow) %v1278_v61, 8  ;;  %1900 = vxpose.xlu0.b32.start.end [1/1] (short) (narrow) %v1275_v1, 8  ;;  %v1544_v61 = vcombine.low %v1500_v60, %v1532_v57  ;;  %v1541_v1 = vcombine.high %v1484_v47, %v1516_v45  ;;  %v1546_v26 = vcombine.low %v1507_v2, %v1539_v62 }
 0xf22   :  { %v1545_v34 = vcombine.high %v1500_v60, %v1532_v57  ;;  %v1547_v35 = vcombine.high %v1507_v2, %v1539_v62 }
 0xf25   :  { %2060 = vxpose.xlu1.b32.start.end [1/1] (short) (narrow) %v1406_v4, 8  ;;  %1964 = vxpose.xlu0.b32.start.end [1/1] (short) (narrow) %v1277_v9, 8 }
 0xf29   :  { %2124 = vxpose.xlu1.b32.start.end [1/1] (short) (narrow) %v1408_v13, 8  ;;  %2028 = vxpose.xlu0.b32.start.end [1/1] (short) (narrow) %v1279_v17, 8 }
 0xf2d   :  { %2188 = vxpose.xlu1.b32.start.end [1/1] (short) (narrow) %v1410_v21, 8  ;;  %2092 = vxpose.xlu0.b32.start.end [1/1] (short) (narrow) %v1407_v29, 8 }
 0xf31   :  { %2252 = vxpose.xlu1.b32.start.end [1/1] (short) (narrow) %v1412_v7, 8  ;;  %2156 = vxpose.xlu0.b32.start.end [1/1] (short) (narrow) %v1409_v46, 8 }
 0xf35   :  { %2316 = vxpose.xlu1.b32.start.end [1/1] (short) (narrow) %v1540_v52, 8  ;;  %2220 = vxpose.xlu0.b32.start.end [1/1] (short) (narrow) %v1411_v54, 8 }
 0xf39   :  { %2380 = vxpose.xlu1.b32.start.end [1/1] (short) (narrow) %v1542_v56, 8  ;;  %2284 = vxpose.xlu0.b32.start.end [1/1] (short) (narrow) %v1413_v59, 8 }
 0xf3d   :  { %2444 = vxpose.xlu1.b32.start.end [1/1] (short) (narrow) %v1544_v61, 8  ;;  %2348 = vxpose.xlu0.b32.start.end [1/1] (short) (narrow) %v1541_v1, 8 }
 0xf41   :  { %2508 = vxpose.xlu1.b32.start.end [1/1] (short) (narrow) %v1546_v26, 8  ;;  %2412 = vxpose.xlu0.b32.start.end [1/1] (short) (narrow) %v1543_v25, 8 }
 0xf45   :  { %2476 = vxpose.xlu0.b32.start.end [1/1] (short) (narrow) %v1545_v34, 8 }
 0xf49   :  { %2540 = vxpose.xlu0.b32.start.end [1/1] (short) (narrow) %v1547_v35, 8 }
 0xf89   :  { %v1596_v49 = vpop.trf.xlu1  ;;  %v1564_v4 = vpop.trf.xlu0 }
 0xf8d   :  { %v1692_v5 = vpop.trf.xlu1  ;;  %v1628_v6 = vpop.trf.xlu0 }
 0xf8e   :  { %v2572_v28 = vcombine.low %v1564_v4, %v1628_v6 }
 0xf90   :  { %v5720_v31 = vrot.slane %v2572_v28, %v5588_v42 }
 0xf91   :  { %v1756_v8 = vpop.trf.xlu1  ;;  %v1660_v9 = vpop.trf.xlu0 }
 0xf92   :  { %v2580_v13 = vcombine.low %v1596_v49, %v1660_v9  ;;  %v2588_v16 = vcombine.low %v1692_v5, %v1756_v8 }
 0xf94   :  { %v5711_v39 = vrot.slane %v2580_v13, %v5588_v42  ;;  %v5714_v19 = vrot.slane %v2588_v16, %v5588_v42 }
 0xf95   :  { %v1820_v24 = vpop.trf.xlu1  ;;  %v1724_v23 = vpop.trf.xlu0 }
 0xf96   :  { %v2604_v41 = vcombine.low %v5720_v31, %v5711_v39 }
 0xf98   :  { %v2612_v30 = vrot.slane %v2604_v41, %v5613_v63 }
 0xf99   :  { %v1884_v32 = vpop.trf.xlu1  ;;  %v1788_v43 = vpop.trf.xlu0 }
 0xf9a   :  { %v2596_v12 = vcombine.low %v1724_v23, %v1788_v43  ;;  %v2640_v38 = vcombine.low %v1820_v24, %v1884_v32 }
 0xf9c   :  { %v5708_v27 = vrot.slane %v2596_v12, %v5588_v42  ;;  %v5725_v37 = vrot.slane %v2640_v38, %v5588_v42 }
 0xf9d   :  { %v1948_v44 = vpop.trf.xlu1  ;;  %v1852_v50 = vpop.trf.xlu0 }
 0xf9e   :  { %v2620_v36 = vcombine.low %v5714_v19, %v5708_v27 }
 0xfa0   :  { %v2628_v52 = vrot.slane %v2620_v36, %v5613_v63  ;;  %v2621_v36 = vcombine.high %v5714_v19, %v5708_v27 }
 0xfa1   :  { %v2012_v33 = vpop.trf.xlu1  ;;  %v1916_v10 = vpop.trf.xlu0 }
 0xfa2   :  { %v2648_v14 = vcombine.low %v1852_v50, %v1916_v10  ;;  %v2656_v21 = vcombine.low %v1948_v44, %v2012_v33  ;;  %v2636_v58 = vcombine.low %v2612_v30, %v2628_v52  ;;  %v2637_v60 = vcombine.high %v2612_v30, %v2628_v52 }
 0xfa3   :  { %v2635_v27 = vrot.slane %v2621_v36, %v5613_v63 }
 0xfa4   :  { %v5717_v20 = vrot.slane %v2648_v14, %v5588_v42  ;;  %v2663_v45 = vrot.slane %v2656_v21, %v5588_v42 }
 0xfa5   :  { %v2076_v17 = vpop.trf.xlu1  ;;  %v1980_v18 = vpop.trf.xlu0 }
 0xfa6   :  { %v2672_v7 = vcombine.low %v5725_v37, %v5717_v20 }
 0xfa8   :  { %v2680_v54 = vrot.slane %v2672_v7, %v5613_v63 }
 0xfa9   :  { %v2140_v22 = vpop.trf.xlu1  ;;  %v2044_v29 = vpop.trf.xlu0 }
 0xfaa   :  { %v2664_v40 = vcombine.low %v1980_v18, %v2044_v29  ;;  %v2708_v24 = vcombine.low %v2076_v17, %v2140_v22 }
 0xfac   :  { %v2671_v46 = vrot.slane %v2664_v40, %v5588_v42  ;;  %v2715_v13 = vrot.slane %v2708_v24, %v5588_v42  ;;  %v2673_v40 = vcombine.high %v5725_v37, %v5717_v20 }
 0xfad   :  { %v2204_v47 = vpop.trf.xlu1  ;;  %v2108_v51 = vpop.trf.xlu0 }
 0xfae   :  { %v2688_v53 = vcombine.low %v2663_v45, %v2671_v46  ;;  %v2689_v17 = vcombine.high %v2663_v45, %v2671_v46  ;;  %v2687_v19 = vrot.slane %v2673_v40, %v5613_v63 }
 0xfb0   :  { %v2696_v55 = vrot.slane %v2688_v53, %v5613_v63  ;;  %v2703_v45 = vrot.slane %v2689_v17, %v5613_v63 }
 0xfb1   :  { %v2268_v56 = vpop.trf.xlu1  ;;  %v2172_v57 = vpop.trf.xlu0 }
 0xfb2   :  { %v2704_v59 = vcombine.low %v2680_v54, %v2696_v55  ;;  %v2705_v61 = vcombine.high %v2680_v54, %v2696_v55  ;;  %v2716_v6 = vcombine.low %v2108_v51, %v2172_v57  ;;  %v2724_v8 = vcombine.low %v2204_v47, %v2268_v56 }
 0xfb3   :  { %v2605_v47 = vcombine.high %v5720_v31, %v5711_v39  ;;  %v2706_v31 = vcombine.low %v2687_v19, %v2703_v45  ;;  %v2707_v57 = vcombine.high %v2687_v19, %v2703_v45 }
 0xfb4   :  { %v5265_v62 = vpack.c.bf16 %v2704_v59, %v2636_v58  ;;  %v5271_v1 = vpack.c.bf16 %v2705_v61, %v2637_v60  ;;  %v2723_v50 = vrot.slane %v2716_v6, %v5588_v42  ;;  %v2731_v33 = vrot.slane %v2724_v8, %v5588_v42 }
 0xfb5   :  { %v2332_v2 = vpop.trf.xlu1  ;;  %v2236_v26 = vpop.trf.xlu0  ;;  %v2619_v39 = vrot.slane %v2605_v47, %v5613_v63 }
 0xfb6   :  { %5266 = vmatpush3.bf16.msra.mxu1 %v5265_v62  ;;  %5272 = vmatpush3.bf16.msra.mxu0 %v5271_v1  ;;  %v2740_v38 = vcombine.low %v2715_v13, %v2723_v50  ;;  %v2741_v58 = vcombine.high %v2715_v13, %v2723_v50 }
 0xfb7   :  { %5267 = vmatprep.subr.bf16.mxu1 %v5381_v0  ;;  %5273 = vmatprep.subr.bf16.mxu0 %v5381_v0  ;;  %v2638_v62 = vcombine.low %v2619_v39, %v2635_v27 }
 0xfb8   :  { %v2748_v46 = vrot.slane %v2740_v38, %v5613_v63 }
 0xfb9   :  { %v2300_v25 = vpop.trf.xlu0  ;;  %v2396_v34 = vpop.trf.xlu1 }
 0xfba   :  { %v2732_v4 = vcombine.low %v2236_v26, %v2300_v25  ;;  %v2776_v44 = vcombine.low %v2332_v2, %v2396_v34  ;;  %v5767_v26 = vld [vmem:[%s5956_s2] sm:$0xff]  ;;  %v5772_v25 = vld [vmem:[%s5956_s2 + $0x8] sm:$0xff]  ;;  %v2639_v34 = vcombine.high %v2619_v39, %v2635_v27 }
 0xfbc   :  { %v2739_v23 = vrot.slane %v2732_v4, %v5588_v42  ;;  %v2783_v18 = vrot.slane %v2776_v44, %v5588_v42  ;;  %v5283_v6 = vpack.c.bf16 %v2707_v57, %v2639_v34 }
 0xfbd   :  { %v2364_v35 = vpop.trf.xlu0  ;;  %v2460_v49 = vpop.trf.xlu1 }
 0xfbe   :  { %v2756_v16 = vcombine.low %v2731_v33, %v2739_v23  ;;  %v2757_v20 = vcombine.high %v2731_v33, %v2739_v23 }
 0xfc0   :  { %v2764_v41 = vrot.slane %v2756_v16, %v5613_v63  ;;  %v2771_v1 = vrot.slane %v2757_v20, %v5613_v63 }
 0xfc1   :  { %v2428_v5 = vpop.trf.xlu0  ;;  %v2524_v43 = vpop.trf.xlu1 }
 0xfc2   :  { %v2784_v9 = vcombine.low %v2364_v35, %v2428_v5  ;;  %v2792_v12 = vcombine.low %v2460_v49, %v2524_v43  ;;  %v2772_v37 = vcombine.low %v2748_v46, %v2764_v41  ;;  %v2773_v30 = vcombine.high %v2748_v46, %v2764_v41  ;;  %v5795_v43 = vld [vmem:[%s5956_s2 + $0x18] sm:$0xff] }
 0xfc3   :  { %v5277_v35 = vpack.c.bf16 %v2706_v31, %v2638_v62  ;;  %v2755_v49 = vrot.slane %v2741_v58, %v5613_v63 }
 0xfc4   :  { %v2791_v10 = vrot.slane %v2784_v9, %v5588_v42  ;;  %v2799_v22 = vrot.slane %v2792_v12, %v5588_v42 }
 0xfc5   :  { %v2492_v32 = vpop.trf.xlu0  ;;  %v2774_v8 = vcombine.low %v2755_v49, %v2771_v1  ;;  %v2775_v9 = vcombine.high %v2755_v49, %v2771_v1 }
 0xfc6   :  { %v2808_v21 = vcombine.low %v2783_v18, %v2791_v10  ;;  %v2809_v54 = vcombine.high %v2783_v18, %v2791_v10 }
 0xfc8   :  { %v2816_v51 = vrot.slane %v2808_v21, %v5613_v63  ;;  %v2823_v2 = vrot.slane %v2809_v54, %v5613_v63 }
 0xfc9   :  { %v2556_v14 = vpop.trf.xlu0 }
 0xfca   :  { %v2800_v28 = vcombine.low %v2492_v32, %v2556_v14  ;;  %v5790_v32 = vld [vmem:[%s5956_s2 + $0x10] sm:$0xff]  ;;  %s5388_s2 = smov 32  }
 0xfcc   :  { %v2807_v29 = vrot.slane %v2800_v28, %v5588_v42 }
 0xfce   :  { %v2824_v7 = vcombine.low %v2799_v22, %v2807_v29  ;;  %v2825_v52 = vcombine.high %v2799_v22, %v2807_v29 }
 0xfd0   :  { %v2832_v53 = vrot.slane %v2824_v7, %v5613_v63  ;;  %v2839_v59 = vrot.slane %v2825_v52, %v5613_v63 }
 0xfd2   :  { %v2840_v55 = vcombine.low %v2816_v51, %v2832_v53  ;;  %v2841_v56 = vcombine.high %v2816_v51, %v2832_v53  ;;  %v2842_v4 = vcombine.low %v2823_v2, %v2839_v59  ;;  %v2843_v5 = vcombine.high %v2823_v2, %v2839_v59 }
 0xfd4   :  { %v5268_v60 = vpack.c.bf16 %v2840_v55, %v2772_v37  ;;  %v5274_v61 = vpack.c.bf16 %v2841_v56, %v2773_v30  ;;  %v5280_v24 = vpack.c.bf16 %v2842_v4, %v2774_v8  ;;  %v5286_v23 = vpack.c.bf16 %v2843_v5, %v2775_v9 }
 0xfd6   :  { %5269 = vmatpush3.bf16.msra.mxu1 %v5268_v60  ;;  %5275 = vmatpush3.bf16.msra.mxu0 %v5274_v61 }
 0xfd7   :  { %5276 = vmatprep.subr.bf16.mxu1 %v5381_v0  ;;  %5282 = vmatprep.subr.bf16.mxu0 %v5381_v0 }
 0xfd9   :  { %5133 = vmatmul.mubr.msk.f32.vlgmr.msra.gmra.mrb[4].mxu1 %vm154_vm2, %v5767_v26  ;;  %5144 = vmatmul.mubr.msk.f32.vlgmr.msra.gmra.mrb[14].mxu0 %vm154_vm2, %v5772_v25 }
 0xfda   :  { %5278 = vmatpush3.bf16.msra.mxu1 %v5277_v35  ;;  %5284 = vmatpush3.bf16.msra.mxu0 %v5283_v6 }
 0xfdb   :  { %5279 = vmatprep.subr.bf16.mxu1 %v5381_v0  ;;  %5285 = vmatprep.subr.bf16.mxu0 %v5381_v0 }
 0xfdc   :  { %5154 = vmatprep.mubr.msk.f32.mxu1 %vm5382_vm0, %v5383_v3  ;;  %5165 = vmatprep.mubr.msk.f32.mxu0 %vm5382_vm0, %v5383_v3 }
 0xfde   :  { %5281 = vmatpush3.bf16.msra.mxu1 %v5280_v24  ;;  %5287 = vmatpush3.bf16.msra.mxu0 %v5286_v23 }
 0xfe1   :  { %5155 = vmatmul.mubr.msk.f32.vlgmr.msra.gmra.mrb[6].mxu1 %vm154_vm2, %v5790_v32  ;;  %5166 = vmatmul.mubr.msk.f32.vlgmr.msra.gmra.mrb[16].mxu0 %vm154_vm2, %v5795_v43 }
0x10ac   :  { %v2913_v44 = vpop.f32.mrb[4].mxu1  ;;  %v2986_v50 = vpop.f32.mrb[14].mxu0 }
0x10ad   :  { %v5134_v33 = vpop.f32.mrb[5].mxu1  ;;  %v5145_v10 = vpop.f32.mrb[15].mxu0  ;;  %3136 = vxpose.xlu1.b32.start.end [1/1] (short) (narrow) %v2913_v44, 8  ;;  %3168 = vxpose.xlu0.b32.start.end [1/1] (short) (narrow) %v2986_v50, 8 }
0x10b4   :  { %v3059_v12 = vpop.f32.mrb[6].mxu1  ;;  %v3132_v13 = vpop.f32.mrb[16].mxu0 }
0x10b5   :  { %3200 = vxpose.xlu1.b32.start.end [1/1] (short) (narrow) %v3059_v12, 8  ;;  %v5156_v16 = vpop.f32.mrb[7].mxu1  ;;  %3232 = vxpose.xlu0.b32.start.end [1/1] (short) (narrow) %v3132_v13, 8  ;;  %v5167_v14 = vpop.f32.mrb[17].mxu0 }
0x112d   :  { %v3152_v18 = vpop.trf.xlu1  ;;  %v3184_v28 = vpop.trf.xlu0 }
0x1135   :  { %v3216_v17 = vpop.trf.xlu1  ;;  %v3248_v38 = vpop.trf.xlu0 }
0x1136   :  { %v3264_v21 = vcombine.low %v3152_v18, %v3216_v17  ;;  %v3265_v22 = vcombine.high %v3152_v18, %v3216_v17  ;;  %v3280_v29 = vcombine.low %v3184_v28, %v3248_v38  ;;  %v3281_v36 = vcombine.high %v3184_v28, %v3248_v38 }
0x1138   :  { %v3272_v40 = vrot.slane %v3264_v21, %v5588_v42  ;;  %v3279_v41 = vrot.slane %v3265_v22, %v5588_v42  ;;  %v3288_v7 = vrot.slane %v3280_v29, %v5588_v42  ;;  %v3295_v47 = vrot.slane %v3281_v36, %v5588_v42 }
0x113a   :  { %v3296_v45 = vcombine.low %v3272_v40, %v3288_v7  ;;  %v3297_v46 = vcombine.high %v3272_v40, %v3288_v7  ;;  %v3312_v51 = vcombine.low %v3279_v41, %v3295_v47 }
0x113c   :  { %v3304_v52 = vrot.slane %v3296_v45, %v5613_v63  ;;  %v3311_v19 = vrot.slane %v3297_v46, %v5613_v63  ;;  %v3319_v37 = vrot.slane %v3312_v51, %v5613_v63 }
0x113e   :  { %v3324_v53 = vsel %vm3323_vm4, %v3304_v52, -inf  ;;  %v3320_v27 = vcombine.high %v3304_v52, %v5383_v3  ;;  %v3330_v30 = vsel %vm3323_vm4, %v3311_v19, -inf  ;;  %v3321_v54 = vcombine.high %v3311_v19, %v5383_v3 }
0x113f   :  { %3325 = vmax.xlane.f32.xlu1 %v3324_v53  ;;  %v3336_v55 = vsel %vm3323_vm4, %v3319_v37, -inf  ;;  %v3322_v39 = vcombine.high %v3319_v37, %v5383_v3 }
0x1140   :  { %v3327_v20 = vsel %vm3323_vm4, %v3320_v27, -inf  ;;  %v3333_v56 = vsel %vm3323_vm4, %v3321_v54, -inf }
0x1141   :  { %3328 = vmax.xlane.f32.xlu0 %v3327_v20  ;;  %v3339_v31 = vsel %vm3323_vm4, %v3322_v39, -inf }
0x1143   :  { %3331 = vmax.xlane.f32.xlu1 %v3330_v30 }
0x1145   :  { %3337 = vmax.xlane.f32.xlu0 %v3336_v55 }
0x1147   :  { %3334 = vmax.xlane.f32.xlu1 %v3333_v56 }
0x114b   :  { %3340 = vmax.xlane.f32.xlu1 %v3339_v31 }
0x11cc   :  { %v3326_v57 = vpop.xlane.xlu1 %3325 }
0x11cd   :  { %v3342_v58 = vsub.f32 %v3304_v52, %v3326_v57 }
0x11ce   :  { %v3329_v59 = vpop.xlane.xlu0 %3328 }
0x11cf   :  { %v3348_v60 = vmul.f32 1.442695, %v3342_v58  ;;  %v3343_v61 = vsub.f32 %v3320_v27, %v3329_v59 }
0x11d0   :  { %v3332_v62 = vpop.xlane.xlu1 %3331 }
0x11d1   :  { %5338 = vpow2.f32 %v3348_v60  ;;  %v3350_v1 = vmul.f32 1.442695, %v3343_v61  ;;  %v3344_v2 = vsub.f32 %v3311_v19, %v3332_v62 }
0x11d2   :  { %v3338_v34 = vpop.xlane.xlu0 %3337 }
0x11d3   :  { %5340 = vpow2.f32 %v3350_v1  ;;  %v3352_v35 = vmul.f32 1.442695, %v3344_v2  ;;  %v3346_v49 = vsub.f32 %v3319_v37, %v3338_v34 }
0x11d4   :  { %v3335_v4 = vpop.xlane.xlu1 %3334 }
0x11d5   :  { %5342 = vpow2.f32 %v3352_v35  ;;  %v3356_v5 = vmul.f32 1.442695, %v3346_v49  ;;  %v3345_v6 = vsub.f32 %v3321_v54, %v3335_v4 }
0x11d7   :  { %5344 = vpow2.f32 %v3356_v5  ;;  %v3354_v8 = vmul.f32 1.442695, %v3345_v6 }
0x11d8   :  { %v3341_v9 = vpop.xlane.xlu1 %3340 }
0x11d9   :  { %5346 = vpow2.f32 %v3354_v8  ;;  %v3347_v24 = vsub.f32 %v3322_v39, %v3341_v9 }
0x11db   :  { %v5339_v23 = vpop.eup %5338  ;;  %v3358_v44 = vmul.f32 1.442695, %v3347_v24 }
0x11dc   :  { %v3360_v50 = vsel %vm3323_vm4, %v5339_v23, 0.0 }
0x11dd   :  { %v5341_v33 = vpop.eup %5340  ;;  %5348 = vpow2.f32 %v3358_v44  ;;  %3361 = vadd.xlane.f32.xlu0 %v3360_v50 }
0x11de   :  { %v3363_v10 = vsel %vm3323_vm4, %v5341_v33, 0.0 }
0x11df   :  { %v5343_v12 = vpop.eup %5342  ;;  %3364 = vadd.xlane.f32.xlu1 %v3363_v10 }
0x11e0   :  { %v3366_v13 = vsel %vm3323_vm4, %v5343_v12, 0.0 }
0x11e1   :  { %v5345_v16 = vpop.eup %5344  ;;  %3367 = vadd.xlane.f32.xlu0 %v3366_v13 }
0x11e2   :  { %v3372_v28 = vsel %vm3323_vm4, %v5345_v16, 0.0 }
0x11e3   :  { %v5347_v14 = vpop.eup %5346 }
0x11e4   :  { %v3369_v18 = vsel %vm3323_vm4, %v5347_v14, 0.0 }
0x11e5   :  { %3370 = vadd.xlane.f32.xlu1 %v3369_v18  ;;  %3373 = vadd.xlane.f32.xlu0 %v3372_v28 }
0x11e7   :  { %v5349_v17 = vpop.eup %5348 }
0x11e8   :  { %v3375_v38 = vsel %vm3323_vm4, %v5349_v17, 0.0 }
0x11e9   :  { %3376 = vadd.xlane.f32.xlu1 %v3375_v38 }
0x126a   :  { %v3362_v21 = vpop.xlane.xlu0 %3361 }
0x126b   :  { %5350 = vrcp.f32 %v3362_v21 }
0x126c   :  { %v3365_v22 = vpop.xlane.xlu1 %3364 }
0x126e   :  { %v3368_v29 = vpop.xlane.xlu0 %3367 }
0x126f   :  { %5352 = vrcp.f32 %v3368_v29 }
0x1272   :  { %v3371_v36 = vpop.xlane.xlu1 %3370  ;;  %v3374_v40 = vpop.xlane.xlu0 %3373 }
0x1273   :  { %5354 = vrcp.f32 %v3371_v36 }
0x1274   :  { %5356 = vrcp.f32 %v3374_v40 }
0x1275   :  { %v5351_v41 = vpop.eup %5350  ;;  %5358 = vrcp.f32 %v3365_v22 }
0x1276   :  { %v3377_v7 = vpop.xlane.xlu1 %3376  ;;  %v3379_v47 = vmul.f32 %v5351_v41, %v5339_v23 }
0x1277   :  { %5360 = vrcp.f32 %v3377_v7 }
0x1278   :  { %3390 = vxpose.xlu0.b32.start.end [1/1] (short) (narrow) %v3379_v47, 8 }
0x1279   :  { %v5353_v45 = vpop.eup %5352 }
0x127a   :  { %v3383_v46 = vmul.f32 %v5353_v45, %v5343_v12 }
0x127c   :  { %3454 = vxpose.xlu0.b32.start.end [1/1] (short) (narrow) %v3383_v46, 8  ;;  %v4934_v46 = vmul.f32 -1.442695, %v5600_v48 }
0x127d   :  { %v5355_v51 = vpop.eup %5354 }
0x127e   :  { %v5357_v52 = vpop.eup %5356  ;;  %v3385_v53 = vmul.f32 %v5355_v51, %v5347_v14  ;;  %5362 = vpow2.f32 %v4934_v46 }
0x127f   :  { %v3387_v27 = vmul.f32 %v5357_v52, %v5345_v16  ;;  %v5359_v19 = vpop.eup %5358 }
0x1280   :  { %3486 = vxpose.xlu0.b32.start.end [1/1] (short) (narrow) %v3385_v53, 8  ;;  %v3381_v30 = vmul.f32 %v5359_v19, %v5341_v33 }
0x1281   :  { %v5361_v20 = vpop.eup %5360  ;;  %3518 = vxpose.xlu1.b32.start.end [1/1] (short) (narrow) %v3387_v27, 8 }
0x1282   :  { %v3389_v37 = vmul.f32 %v5361_v20, %v5349_v17 }
0x1284   :  { %3550 = vxpose.xlu0.b32.start.end [1/1] (short) (narrow) %v3389_v37, 8 }
0x1285   :  { %3422 = vxpose.xlu1.b32.start.end [1/1] (short) (narrow) %v3381_v30, 8 }
0x12f8   :  { %v3406_v54 = vpop.trf.xlu0 }
0x12fc   :  { %v3470_v55 = vpop.trf.xlu0 }
0x12fd   :  { %v3582_v31 = vcombine.low %v3406_v54, %v3470_v55  ;;  %v3583_v34 = vcombine.high %v3406_v54, %v3470_v55 }
0x12ff   :  { %v3590_v35 = vrot.slane %v3582_v31, %v5588_v42  ;;  %v3597_v23 = vrot.slane %v3583_v34, %v5588_v42 }
0x1300   :  { %v3502_v56 = vpop.trf.xlu0 }
0x1301   :  { %v3534_v39 = vpop.trf.xlu1 }
0x1302   :  { %v3621_v61 = vrot.slane %v3534_v39, %v5588_v42  ;;  %v3614_v2 = vcombine.high %v3534_v39, %v5383_v3 }
0x1304   :  { %v3566_v57 = vpop.trf.xlu0  ;;  %v3628_v24 = vrot.slane %v3614_v2, %v5588_v42 }
0x1305   :  { %v3438_v58 = vpop.trf.xlu1  ;;  %v3629_v59 = vcombine.high %v3566_v57, %v5383_v3  ;;  %v3636_v60 = vrot.slane %v3566_v57, %v5588_v42 }
0x1306   :  { %v3598_v62 = vcombine.low %v3438_v58, %v3502_v56  ;;  %v3599_v1 = vcombine.high %v3438_v58, %v3502_v56 }
0x1307   :  { %v3676_v4 = vcombine.low %v3621_v61, %v3636_v60  ;;  %v3643_v5 = vrot.slane %v3629_v59, %v5588_v42  ;;  %v3677_v44 = vcombine.high %v3621_v61, %v3636_v60 }
0x1308   :  { %v3606_v49 = vrot.slane %v3598_v62, %v5588_v42  ;;  %v3613_v6 = vrot.slane %v3599_v1, %v5588_v42 }
0x1309   :  { %v3684_v50 = vrot.slane %v3676_v4, %v5613_v63  ;;  %v3692_v10 = vcombine.low %v3628_v24, %v3643_v5  ;;  %v3691_v18 = vrot.slane %v3677_v44, %v5613_v63  ;;  %v3693_v17 = vcombine.high %v3628_v24, %v3643_v5 }
0x130a   :  { %v3644_v8 = vcombine.low %v3590_v35, %v3606_v49  ;;  %v3645_v9 = vcombine.high %v3590_v35, %v3606_v49  ;;  %v3660_v12 = vcombine.low %v3597_v23, %v3613_v6  ;;  %v3661_v28 = vcombine.high %v3597_v23, %v3613_v6 }
0x130b   :  { %v3700_v29 = vrot.slane %v3692_v10, %v5613_v63  ;;  %v3707_v7 = vrot.slane %v3693_v17, %v5613_v63 }
0x130c   :  { %v3652_v33 = vrot.slane %v3644_v8, %v5613_v63  ;;  %v3659_v14 = vrot.slane %v3645_v9, %v5613_v63  ;;  %v3668_v22 = vrot.slane %v3660_v12, %v5613_v63  ;;  %v3675_v41 = vrot.slane %v3661_v28, %v5613_v63 }
0x130e   :  { %v3709_v13 = vcombine.high %v3652_v33, %v3684_v50  ;;  %v3708_v16 = vcombine.low %v3652_v33, %v3684_v50  ;;  %v3711_v38 = vcombine.high %v3659_v14, %v3691_v18  ;;  %v3710_v21 = vcombine.low %v3659_v14, %v3691_v18 }
0x130f   :  { %v3713_v36 = vcombine.high %v3668_v22, %v3700_v29  ;;  %v3712_v40 = vcombine.low %v3668_v22, %v3700_v29  ;;  %v3714_v47 = vcombine.low %v3675_v41, %v3707_v7  ;;  %v3715_v45 = vcombine.high %v3675_v41, %v3707_v7  ;;  %v5380_v22 = vld [vmem:[#allocation2 + $0x14] sm:$0xf] }
0x1310   :  { %3748 = vxpose.xlu0.b32.start.end [1/1] (short) (narrow) %v3709_v13, 8  ;;  %3716 = vxpose.xlu1.b32.start.end [1/1] (short) (narrow) %v3708_v16, 8 }
0x1314   :  { %3812 = vxpose.xlu0.b32.start.end [1/1] (short) (narrow) %v3711_v38, 8  ;;  %3780 = vxpose.xlu1.b32.start.end [1/1] (short) (narrow) %v3710_v21, 8 }
0x1318   :  { %3876 = vxpose.xlu0.b32.start.end [1/1] (short) (narrow) %v3713_v36, 8  ;;  %3844 = vxpose.xlu1.b32.start.end [1/1] (short) (narrow) %v3712_v40, 8 }
0x131c   :  { %4040 = vxpose.xlu0.b32.start.end [1/1] (short) (narrow) %v5767_v26, 32  ;;  %3908 = vxpose.xlu1.b32.start.end [1/1] (short) (narrow) %v3714_v47, 8  ;;  %v5363_v26 = vpop.eup %5362 }
0x1329   :  { %3940 = vxpose.xlu0.b32.start.end [1/1] (short) (narrow) %v3715_v45, 8 }
0x132d   :  { %4170 = vxpose.xlu0.b32.start.end [1/1] (short) (narrow) %v5772_v25, 32  ;;  %v776_v25 = vadd.f32 1.0, %v5363_v26 }
0x132f   :  { %5364 = vrcp.f32 %v776_v25 }
0x1339   :  { %v5851_v31 = vpop.eup %5364 }
0x133a   :  { %780 = vrot.lane.b32.xlu1 %v5597_v11, %s5384_s3  ;;  %4299 = vxpose.xlu0.b32.start.end [1/1] (short) (narrow) %v5790_v32, 32  ;;  %v790_v26 = vsub.f32 1.0, %v5851_v31 }
0x1363   :  { %4428 = vxpose.xlu1.b32.start.end [1/1] (short) (narrow) %v5795_v43, 32 }
0x1390   :  { %v3764_v51 = vpop.trf.xlu0  ;;  %v3732_v53 = vpop.trf.xlu1 }
0x1394   :  { %v3828_v52 = vpop.trf.xlu0  ;;  %v3796_v20 = vpop.trf.xlu1 }
0x1395   :  { %v3980_v30 = vcombine.low %v3764_v51, %v3828_v52  ;;  %v3972_v43 = vcombine.low %v3732_v53, %v3796_v20 }
0x1397   :  { %v3987_v55 = vrot.slane %v3980_v30, %v5588_v42  ;;  %v3979_v56 = vrot.slane %v3972_v43, %v5588_v42  ;;  %v814_v30 = vld [vmem:[#allocation4] sm:$0xf]  ;;  %v815_v43 = vld [vmem:[#allocation4 + $0x4] sm:$0xf] }
0x1398   :  { %v3892_v27 = vpop.trf.xlu0  ;;  %v3860_v11 = vpop.trf.xlu1 }
0x1399   :  { %v4004_v61 = vcombine.low %v3979_v56, %v3987_v55  ;;  %v4005_v34 = vcombine.high %v3979_v56, %v3987_v55  ;;  %v818_v55 = vld [vmem:[#allocation4 + $0x10] sm:$0xf] }
0x139b   :  { %v4012_v4 = vrot.slane %v4004_v61, %v5613_v63  ;;  %v4019_v23 = vrot.slane %v4005_v34, %v5613_v63  ;;  %v31_v34 = vld [vmem:[%s5957_s4 + $0x20] sm:$0xff] }
0x139c   :  { %v4056_v19 = vpop.trf.xlu0  ;;  %v3924_v54 = vpop.trf.xlu1 }
0x139d   :  { %5170 = vmatprep.mubr.msk.f32.mxu1 %vm4072_vm5, %v4056_v19  ;;  %v3988_v39 = vcombine.low %v3860_v11, %v3924_v54  ;;  %v816_v54 = vld [vmem:[#allocation4 + $0x8] sm:$0xf] }
0x139f   :  { %v3995_v62 = vrot.slane %v3988_v39, %v5588_v42 }
0x13a0   :  { %v4057_v37 = vpop.trf.xlu0 }
0x13a4   :  { %v4058_v32 = vpop.trf.xlu0 }
0x13a8   :  { %v4059_v48 = vpop.trf.xlu0 }
0x13ac   :  { %v3956_v57 = vpop.trf.xlu0  ;;  %v781_v58 = vpop.permute.xlu1 %780 }
0x13ad   :  { %v3996_v59 = vcombine.low %v3892_v27, %v3956_v57  ;;  %v783_v60 = vmul.f32 %v5851_v31, %v781_v58 }
0x13af   :  { %v4003_v1 = vrot.slane %v3996_v59, %v5588_v42  ;;  %785 = vrot.lane.b32.xlu0 %v783_v60, %s5384_s3  ;;  %v27_v59 = vld [vmem:[%s5957_s4] sm:$0xff]  ;;  %v28_v60 = vld [vmem:[%s5957_s4 + $0x8] sm:$0xff] }
0x13b0   :  { %v4186_v2 = vpop.trf.xlu0  ;;  %v5289_v61 = vpack.c.bf16 %v28_v60, %v27_v59 }
0x13b1   :  { %v4020_v35 = vcombine.low %v3995_v62, %v4003_v1  ;;  %v4021_v49 = vcombine.high %v3995_v62, %v4003_v1  ;;  %5178 = vmatprep.mubr.msk.f32.mxu0 %vm4072_vm5, %v4186_v2  ;;  %v29_v62 = vld [vmem:[%s5957_s4 + $0x10] sm:$0xff]  ;;  %v30_v1 = vld [vmem:[%s5957_s4 + $0x18] sm:$0xff] }
0x13b2   :  { %v5292_v2 = vpack.c.bf16 %v30_v1, %v29_v62 }
0x13b3   :  { %v4028_v5 = vrot.slane %v4020_v35, %v5613_v63  ;;  %v4035_v6 = vrot.slane %v4021_v49, %v5613_v63  ;;  %v32_v35 = vld [vmem:[%s5957_s4 + $0x28] sm:$0xff] }
0x13b4   :  { %v4187_v8 = vpop.trf.xlu0  ;;  %v5295_v49 = vpack.c.bf16 %v32_v35, %v31_v34 }
0x13b5   :  { %v4036_v9 = vcombine.low %v4012_v4, %v4028_v5  ;;  %v4037_v24 = vcombine.high %v4012_v4, %v4028_v5  ;;  %v4038_v44 = vcombine.low %v4019_v23, %v4035_v6  ;;  %v4039_v50 = vcombine.high %v4019_v23, %v4035_v6  ;;  %v33_v4 = vld [vmem:[%s5957_s4 + $0x30] sm:$0xff]  ;;  %v34_v5 = vld [vmem:[%s5957_s4 + $0x38] sm:$0xff] }
0x13b6   :  { %v5298_v6 = vpack.c.bf16 %v34_v5, %v33_v4 }
0x13b7   :  { %5168 = vmatprep.subr.mxu1 %v4036_v9  ;;  %5176 = vmatprep.subr.mxu0 %v4037_v24 }
0x13b8   :  { %5169 = vmatpush3.msra.mxu1 %v4036_v9  ;;  %5177 = vmatpush3.msra.mxu0 %v4037_v24  ;;  %v4188_v33 = vpop.trf.xlu0 }
0x13b9   :  { %5184 = vmatprep.subr.mxu1 %v4038_v44  ;;  %5192 = vmatprep.subr.mxu0 %v4039_v50 }
0x13ba   :  { %5171 = vmatmul.mubr.msk.f32.vlgmr.msra.gmra.mrb[8].mxu1 %vm4072_vm5, %v4057_v37  ;;  %5179 = vmatmul.mubr.msk.f32.vlgmr.msra.gmra.mrb[18].mxu0 %vm4072_vm5, %v4187_v8  ;;  %v796_v37 = vmul.f32 %v5851_v31, %v5551_v15 }
0x13bb   :  { %5185 = vmatpush3.msra.mxu1 %v4038_v44  ;;  %5193 = vmatpush3.msra.mxu0 %v4039_v50 }
0x13bc   :  { %5173 = vmatprep.mubr.msk.f32.mxu1 %vm4072_vm5, %v4058_v32  ;;  %v4189_v10 = vpop.trf.xlu0  ;;  %5181 = vmatprep.mubr.msk.f32.mxu0 %vm4072_vm5, %v4188_v33 }
0x13bd   :  { %5288 = vmatprep.subr.bf16.mxu1 %v5381_v0 }
0x13be   :  { %5174 = vmatmul.mubr.msk.f32.gmra.mrb[10].mxu1 %vm4072_vm5, %v4059_v48  ;;  %5182 = vmatmul.mubr.msk.f32.gmra.mrb[20].mxu0 %vm4072_vm5, %v4189_v10  ;;  %v817_v48 = vld [vmem:[#allocation4 + $0xc] sm:$0xf] }
0x13c0   :  { %v4315_v12 = vpop.trf.xlu0 }
0x13c1   :  { %5186 = vmatprep.mubr.msk.f32.mxu1 %vm4072_vm5, %v4315_v12 }
0x13c4   :  { %v4316_v13 = vpop.trf.xlu0 }
0x13c5   :  { %5187 = vmatmul.mubr.msk.f32.vlgmr.msra.gmra.mrb[12].mxu1 %vm4072_vm5, %v4316_v13 }
0x13c6   :  { %5290 = vmatpush3.bf16.msra.mxu1 %v5289_v61 }
0x13c7   :  { %5291 = vmatprep.subr.bf16.mxu1 %v5381_v0 }
0x13c8   :  { %v4317_v16 = vpop.trf.xlu0 }
0x13c9   :  { %5189 = vmatprep.mubr.msk.f32.mxu1 %vm4072_vm5, %v4317_v16 }
0x13ca   :  { %5293 = vmatpush3.bf16.msra.mxu1 %v5292_v2 }
0x13cb   :  { %5294 = vmatprep.subr.bf16.mxu1 %v5381_v0 }
0x13cc   :  { %v4318_v14 = vpop.trf.xlu0 }
0x13cd   :  { %5190 = vmatmul.mubr.msk.f32.gmra.mrb[14].mxu1 %vm4072_vm5, %v4318_v14 }
0x13ce   :  { %5216 = vmatprep.mubr.msk.f32.mxu1 %vm5382_vm0, %v5383_v3  ;;  %5296 = vmatpush3.bf16.msra.mxu1 %v5295_v49 }
0x13cf   :  { %5297 = vmatprep.subr.bf16.mxu1 %v5381_v0 }
0x13d2   :  { %5299 = vmatpush3.bf16.msra.mxu1 %v5298_v6 }
0x13e3   :  { %v4444_v18 = vpop.trf.xlu1 }
0x13e4   :  { %5194 = vmatprep.mubr.msk.f32.mxu0 %vm4072_vm5, %v4444_v18 }
0x13e7   :  { %v4445_v28 = vpop.trf.xlu1 }
0x13e8   :  { %5195 = vmatmul.mubr.msk.f32.vlgmr.msra.gmra.mrb[22].mxu0 %vm4072_vm5, %v4445_v28 }
0x13eb   :  { %v4446_v17 = vpop.trf.xlu1 }
0x13ec   :  { %5197 = vmatprep.mubr.msk.f32.mxu0 %vm4072_vm5, %v4446_v17 }
0x13ef   :  { %v4447_v38 = vpop.trf.xlu1 }
0x13f0   :  { %5198 = vmatmul.mubr.msk.f32.gmra.mrb[24].mxu0 %vm4072_vm5, %v4447_v38 }
0x1421   :  { %v786_v21 = vpop.permute.xlu0 %785 }
0x1422   :  { %v788_v29 = vadd.f32 %v5380_v22, %v786_v21 }
0x1424   :  { %5366 = vtanh.f32 %v788_v29 }
0x142e   :  { %v5367_v36 = vpop.eup %5366 }
0x142f   :  { %792 = vrot.lane.b32.xlu1 %v5367_v36, %s5385_s13 }
0x148d   :  { %v5172_v40 = vpop.f32.mrb[8].mxu1  ;;  %v5180_v41 = vpop.f32.mrb[18].mxu0 }
0x148e   :  { %v4151_v7 = vpop.f32.mrb[9].mxu1  ;;  %v4280_v47 = vpop.f32.mrb[19].mxu0 }
0x148f   :  { %4589 = vxpose.xlu1.b32.start [1/4] (short) (narrow) %v4280_v47, 8 }
0x1491   :  { %v5175_v45 = vpop.f32.mrb[10].mxu1  ;;  %v5183_v46 = vpop.f32.mrb[20].mxu0 }
0x1492   :  { %v4161_v51 = vpop.f32.mrb[11].mxu1  ;;  %v4290_v52 = vpop.f32.mrb[21].mxu0 }
0x1493   :  { %4590 = vxpose.xlu1.b32.cont [2/4] (short) (narrow) %v5180_v41, 8 }
0x1497   :  { %4591 = vxpose.xlu1.b32.cont [3/4] (short) (narrow) %v4290_v52, 8 }
0x1498   :  { %v5188_v53 = vpop.f32.mrb[12].mxu1 }
0x1499   :  { %v4409_v27 = vpop.f32.mrb[13].mxu1 }
0x149b   :  { %4592 = vxpose.xlu1.b32.end [4/4] (short) (narrow) %v5183_v46, 8 }
0x14a0   :  { %v5191_v19 = vpop.f32.mrb[14].mxu1 }
0x14a1   :  { %v793_v20 = vpop.permute.xlu1 %792  ;;  %v4419_v25 = vpop.f32.mrb[15].mxu1 }
0x14a2   :  { %v795_v11 = vmul.f32 %v793_v20, %v790_v26 }
0x14a4   :  { %v797_v32 = vadd.f32 %v796_v37, %v795_v11 }
0x14a6   :  { %799 = vrot.lane.b32.xlu0 %v797_v32, %s5384_s3 }
0x14aa   :  { %4750 = vrot.lane.b32.xlu0 %v814_v30, %s5388_s2 }
0x14ae   :  { %4752 = vrot.lane.b32.xlu0 %v815_v43, %s5388_s2 }
0x14b2   :  { %4754 = vrot.lane.b32.xlu0 %v816_v54, %s5388_s2 }
0x14b6   :  { %4756 = vrot.lane.b32.xlu0 %v817_v48, %s5388_s2 }
0x14ba   :  { %4758 = vrot.lane.b32.xlu0 %v818_v55, %s5388_s2 }
0x14bb   :  { %v5196_v56 = vpop.f32.mrb[22].mxu0 }
0x14bc   :  { %v4538_v39 = vpop.f32.mrb[23].mxu0 }
0x14bd   :  { %4653 = vxpose.xlu1.b32.start [1/4] (short) (narrow) %v4538_v39, 8 }
0x14c1   :  { %4654 = vxpose.xlu1.b32.cont [2/4] (short) (narrow) %v5196_v56, 8 }
0x14c3   :  { %v5199_v15 = vpop.f32.mrb[24].mxu0 }
0x14c4   :  { %v4548_v31 = vpop.f32.mrb[25].mxu0 }
0x14c5   :  { %4655 = vxpose.xlu1.b32.cont [3/4] (short) (narrow) %v4548_v31, 8 }
0x14c9   :  { %4656 = vxpose.xlu1.b32.end [4/4] (short) (narrow) %v5199_v15, 8 }
0x150f   :  { %v4605_v33 = vpop.trf.xlu1 }
0x1518   :  { %v800_v57 = vpop.permute.xlu0 %799 }
0x1519   :  { %803 = vst.msk [vmem:[#allocation4 + $0x14] sm:$0xf] %vm229_vm3, %v800_v57 }
0x151c   :  { %v4751_v8 = vpop.permute.xlu0 %4750 }
0x1520   :  { %v819_v58 = vld [vmem:[#allocation4 + $0x14] sm:$0xf]  ;;  %v4753_v9 = vpop.permute.xlu0 %4752 }
0x1521   :  { %4760 = vrot.lane.b32.xlu0 %v819_v58, %s5388_s2 }
0x1524   :  { %v4755_v24 = vpop.permute.xlu0 %4754 }
0x1528   :  { %v4757_v23 = vpop.permute.xlu0 %4756 }
0x152c   :  { %v4759_v44 = vpop.permute.xlu0 %4758 }
0x153d   :  { %v4669_v0 = vpop.trf.xlu1 }
0x153e   :  { %v4701_v12 = vcombine.low %v4605_v33, %v4669_v0  ;;  %v4702_v13 = vcombine.high %v4605_v33, %v4669_v0 }
0x153f   :  { %4557 = vxpose.xlu0.b32.start [1/4] (short) (narrow) %v4151_v7, 8 }
0x1540   :  { %v4709_v28 = vrot.slane %v4701_v12, %v5588_v42  ;;  %v4716_v17 = vrot.slane %v4702_v13, %v5588_v42 }
0x1543   :  { %4558 = vxpose.xlu0.b32.cont [2/4] (short) (narrow) %v5172_v40, 8 }
0x1547   :  { %4559 = vxpose.xlu0.b32.cont [3/4] (short) (narrow) %v4161_v51, 8 }
0x154b   :  { %4560 = vxpose.xlu0.b32.end [4/4] (short) (narrow) %v5175_v45, 8 }
0x154f   :  { %4621 = vxpose.xlu0.b32.start [1/4] (short) (narrow) %v4409_v27, 8 }
0x1553   :  { %4622 = vxpose.xlu0.b32.cont [2/4] (short) (narrow) %v5188_v53, 8 }
0x1557   :  { %4623 = vxpose.xlu0.b32.cont [3/4] (short) (narrow) %v4419_v25, 8  ;;  %v4955_v25 = vld [vmem:[%s5957_s4 + $0x40] ss:$0 sm:$0xff] }
0x155b   :  { %4624 = vxpose.xlu0.b32.end [4/4] (short) (narrow) %v5191_v19, 8 }
0x1593   :  { %v4761_v50 = vpop.permute.xlu0 %4760 }
0x15bf   :  { %v4573_v10 = vpop.trf.xlu0 }
0x15cf   :  { %v4637_v16 = vpop.trf.xlu0 }
0x15d0   :  { %v4685_v14 = vcombine.low %v4573_v10, %v4637_v16  ;;  %v4686_v18 = vcombine.high %v4573_v10, %v4637_v16 }
0x15d2   :  { %v4693_v38 = vrot.slane %v4685_v14, %v5588_v42  ;;  %v4700_v21 = vrot.slane %v4686_v18, %v5588_v42 }
0x15d4   :  { %v4717_v22 = vcombine.low %v4693_v38, %v4709_v28  ;;  %v4718_v29 = vcombine.high %v4693_v38, %v4709_v28  ;;  %v4733_v36 = vcombine.low %v4700_v21, %v4716_v17 }
0x15d6   :  { %v4725_v40 = vrot.slane %v4717_v22, %v5613_v63  ;;  %v4732_v41 = vrot.slane %v4718_v29, %v5613_v63  ;;  %v4740_v7 = vrot.slane %v4733_v36, %v5613_v63 }
0x15d8   :  { %v4741_v47 = vcombine.high %v4725_v40, %v5383_v3  ;;  %v4742_v45 = vcombine.high %v4732_v41, %v5383_v3  ;;  %v4768_v46 = vsel %vm154_vm2, %v4725_v40, %v4751_v8  ;;  %v4743_v42 = vcombine.high %v4740_v7, %v5383_v3 }
0x15d9   :  { %v4770_v63 = vsel %vm154_vm2, %v4732_v41, %v4755_v24  ;;  %v4772_v19 = vsel %vm154_vm2, %v4740_v7, %v4759_v44 }
0x15da   :  { %v4769_v51 = vsel %vm154_vm2, %v4741_v47, %v4753_v9  ;;  %v4771_v53 = vsel %vm154_vm2, %v4742_v45, %v4757_v23  ;;  %v4773_v26 = vsel %vm154_vm2, %v4743_v42, %v4761_v50 }
0x15db   :  { %v4784_v52 = vcombine.low %v4768_v46, %v4769_v51  ;;  %v4785_v27 = vcombine.low %v4770_v63, %v4771_v53  ;;  %v4786_v20 = vcombine.low %v4772_v19, %v4773_v26 }
0x15dd   :  { %5217 = vmatmul.mubr.msk.f32.vlgmr.msra.gmra.mrb[16].mxu1 %vm4787_vm6, %v4784_v52 }
0x15de   :  { %5219 = vmatprep.mubr.msk.f32.mxu1 %vm5382_vm0, %v5383_v3 }
0x15e1   :  { %5220 = vmatmul.mubr.msk.f32.gmra.mrb[18].mxu1 %vm4787_vm6, %v4785_v27 }
0x15e2   :  { %5222 = vmatprep.mubr.msk.f32.mxu1 %vm5382_vm0, %v5383_v3 }
0x15e5   :  { %5223 = vmatmul.mubr.msk.f32.gmra.mrb[20].mxu1 %vm4787_vm6, %v4786_v20 }
0x16b0   :  { %v4860_v37 = vpop.f32.mrb[16].mxu1 }
0x16b1   :  { %v4861_v11 = vadd.f32 %v4955_v25, %v4860_v37  ;;  %v5218_v32 = vpop.f32.mrb[17].mxu1 }
0x16b3   :  { %v4874_v30 = vsel %vm43_vm1, %v4861_v11, -inf }
0x16b4   :  { %4875 = vmax.xlane.f32.xlu0 %v4874_v30  ;;  %v4865_v43 = vpop.f32.mrb[18].mxu1 }
0x16b5   :  { %v4866_v54 = vadd.f32 %v4955_v25, %v4865_v43  ;;  %v5221_v48 = vpop.f32.mrb[19].mxu1 }
0x16b7   :  { %v4877_v55 = vsel %vm43_vm1, %v4866_v54, -inf }
0x16b8   :  { %4878 = vmax.xlane.f32.xlu1 %v4877_v55  ;;  %v4870_v3 = vpop.f32.mrb[20].mxu1 }
0x16b9   :  { %v4871_v56 = vadd.f32 %v4955_v25, %v4870_v3  ;;  %v5224_v39 = vpop.f32.mrb[21].mxu1 }
0x16bb   :  { %v4880_v15 = vsel %vm43_vm1, %v4871_v56, -inf }
0x16bc   :  { %4881 = vmax.xlane.f32.xlu0 %v4880_v15 }
0x1741   :  { %v4876_v31 = vpop.xlane.xlu0 %4875 }
0x1742   :  { %v4883_v57 = vsub.f32 %v4861_v11, %v4876_v31 }
0x1744   :  { %v4886_v58 = vmul.f32 1.442695, %v4883_v57 }
0x1745   :  { %v4879_v59 = vpop.xlane.xlu1 %4878 }
0x1746   :  { %5368 = vpow2.f32 %v4886_v58  ;;  %v4884_v60 = vsub.f32 %v4866_v54, %v4879_v59 }
0x1748   :  { %v4888_v61 = vmul.f32 1.442695, %v4884_v60 }
0x1749   :  { %v4882_v62 = vpop.xlane.xlu0 %4881 }
0x174a   :  { %5370 = vpow2.f32 %v4888_v61  ;;  %v4885_v1 = vsub.f32 %v4871_v56, %v4882_v62 }
0x174c   :  { %v4890_v2 = vmul.f32 1.442695, %v4885_v1 }
0x174e   :  { %5372 = vpow2.f32 %v4890_v2 }
0x1750   :  { %v5369_v34 = vpop.eup %5368 }
0x1751   :  { %v4892_v35 = vsel %vm43_vm1, %v5369_v34, 0.0 }
0x1752   :  { %4893 = vadd.xlane.f32.xlu0 %v4892_v35 }
0x1754   :  { %v5371_v49 = vpop.eup %5370 }
0x1755   :  { %v4895_v4 = vsel %vm43_vm1, %v5371_v49, 0.0 }
0x1756   :  { %4896 = vadd.xlane.f32.xlu1 %v4895_v4 }
0x1758   :  { %v5373_v5 = vpop.eup %5372 }
0x1759   :  { %v4898_v6 = vsel %vm43_vm1, %v5373_v5, 0.0 }
0x175a   :  { %4899 = vadd.xlane.f32.xlu0 %v4898_v6 }
0x17df   :  { %v4894_v8 = vpop.xlane.xlu0 %4893 }
0x17e0   :  { %5374 = vlog2.f32 %v4894_v8 }
0x17e3   :  { %v4897_v9 = vpop.xlane.xlu1 %4896 }
0x17e4   :  { %5376 = vlog2.f32 %v4897_v9 }
0x17e7   :  { %v4900_v24 = vpop.xlane.xlu0 %4899 }
0x17e8   :  { %5378 = vlog2.f32 %v4900_v24 }
0x17ea   :  { %v5375_v23 = vpop.eup %5374 }
0x17eb   :  { %v4902_v44 = vmul.f32 0.6931472, %v5375_v23 }
0x17ed   :  { %v4907_v50 = vadd.f32 %v4902_v44, %v4876_v31 }
0x17ee   :  { %v5377_v33 = vpop.eup %5376 }
0x17ef   :  { %v4910_v10 = vsub.f32 %v4861_v11, %v4907_v50  ;;  %v4904_v0 = vmul.f32 0.6931472, %v5377_v33 }
0x17f1   :  { %4913 = vst.msk [vmem:[%s5958_s5] sm:$0xff] %vm43_vm1, %v4910_v10  ;;  %v4908_v12 = vadd.f32 %v4904_v0, %v4879_v59 }
0x17f2   :  { %v5379_v13 = vpop.eup %5378 }
0x17f3   :  { %v4911_v16 = vsub.f32 %v4866_v54, %v4908_v12  ;;  %v4906_v14 = vmul.f32 0.6931472, %v5379_v13 }
0x17f5   :  { %4914 = vst.msk [vmem:[%s5958_s5 + $0x8] sm:$0xff] %vm43_vm1, %v4911_v16  ;;  %v4909_v18 = vadd.f32 %v4906_v14, %v4882_v62 }
0x17f7   :  { %v4912_v28 = vsub.f32 %v4871_v56, %v4909_v18 }
0x17f9   :  { %4915 = vst.msk [vmem:[%s5958_s5 + $0x10] sm:$0xff] %vm43_vm1, %v4912_v28 }

</bundles_post_ra>
